<compile_context>
chip_gen: v7x
topology: tpu7x:2x2x1
jax: 0.10.0
libtpu: 0.0.40
codegen_flags: <defaults>
</compile_context>

<pallas_src>
import jax
import jax.numpy as jnp
import numpy as np
from jax.experimental import pallas as pl
from jax.experimental.pallas import tpu as pltpu

SCALE = 0.1  # ResidualBlock scale


# ----------------------------- Pallas kernel --------------------------------
def _make_kernel(H, WC, L):
    """Fused FeatureExtractor kernel for one batch element (lane-packed)."""

    def kernel(x_ref, p_ref, bw_ref, b_ref, out_ref, apad_ref):
        # x_ref/out_ref : (H, W*C)      VMEM   packed activation
        # p_ref         : (2L, W*C)     VMEM   PReLU scalar broadcast per lane
        # bw_ref        : (2L*3, WC,WC) VMEM   block-banded conv matrices
        # b_ref         : (2L, W*C)     VMEM   lane-tiled biases
        # apad_ref      : (H+2, W*C)    VMEM   H-padded activation scratch

        # Zero only the 1-row top/bottom halo (interior is always overwritten).
        zrow = jnp.zeros((1, WC), jnp.float32)
        apad_ref[0:1, :] = zrow
        apad_ref[H + 1:H + 2, :] = zrow

        act = x_ref[...]                                     # (H, W*C) f32
        for l in range(L):                                   # static unroll
            res = act
            for ci in range(2):                              # conv1, conv2
                idx = 2 * l + ci
                p = p_ref[idx][None, :]                      # (1, W*C)
                a = jnp.where(act > 0, act, p * act)         # PReLU
                apad_ref[1:H + 1, :] = a                     # interior rows
                # dy = 1 tap reuses the in-register activation directly.
                acc = jnp.dot(a, bw_ref[3 * idx + 1],
                              preferred_element_type=jnp.float32)
                acc = acc + jnp.dot(apad_ref[0:H, :], bw_ref[3 * idx + 0],
                                    preferred_element_type=jnp.float32)
                acc = acc + jnp.dot(apad_ref[2:H + 2, :], bw_ref[3 * idx + 2],
                                    preferred_element_type=jnp.float32)
                act = acc + b_ref[idx][None, :]              # bias
            act = res + SCALE * act                          # residual
        out_ref[...] = act

    return kernel


# --------------------------- weight repacking --------------------------------
def _band_matrices(w9, C, W):
    """(9, Cin, Cout) HWIO taps -> (3, W*C, W*C) block-banded matrices, one per dy.

    B[dy, i*C + cin, j*C + cout] = w[dy, i-j+1, cin, cout] when |i-j| <= 1,
    so  (row_h_packed @ B[dy]) implements the dx shifts, W-boundary zero pad
    and the Cin->Cout mixing of a 3x3 SAME conv in a single dense matmul.
    """
    w = w9.reshape(3, 3, C, C)                               # (dy, dx, cin, cout)
    i = jnp.arange(W)[:, None]
    j = jnp.arange(W)[None, :]
    d = i - j + 1                                            # dx tap index
    valid = (d >= 0) & (d <= 2)
    dcl = jnp.clip(d, 0, 2)
    blocks = jnp.where(valid[None, :, :, None, None], w[:, dcl], 0.0)
    # blocks[dy, i, j, cin, cout] -> B[dy, i*C+cin, j*C+cout]
    return blocks.transpose(0, 1, 3, 2, 4).reshape(3, W * C, W * C)


# ------------------------------- wrapper -------------------------------------
@jax.jit
def feature_extractor(x_nhwc, all_params):
    """FeatureExtractor.forward.  x_nhwc: (N, H, W, C) f32 -> (N, H, W, C)."""
    N, H, W, C = x_nhwc.shape
    WC = W * C
    L = len(all_params)

    x_packed = x_nhwc.reshape(N, H, WC)                      # lane-dense pack

    bw, bias, prelu = [], [], []
    for prm in all_params:
        for wk, bk, pk in (("w1", "b1", "p1"), ("w2", "b2", "p2")):
            bw.append(_band_matrices(prm[wk], C, W))          # (3, WC, WC)
            bias.append(jnp.tile(prm[bk].reshape(C), W))      # (WC,)
            prelu.append(jnp.full((WC,), prm[pk][0], jnp.float32))
    bw_all = jnp.concatenate(bw, axis=0)                      # (2L*3, WC, WC)
    b_all = jnp.stack(bias, axis=0)                           # (2L, WC)
    p_all = jnp.stack(prelu, axis=0)                          # (2L, WC)

    out = pl.pallas_call(
        _make_kernel(H, WC, L),
        out_shape=jax.ShapeDtypeStruct((N, H, WC), jnp.float32),
        grid=(N,),
        in_specs=[
            pl.BlockSpec((None, H, WC), lambda n: (n, 0, 0)),        # x
            pl.BlockSpec((2 * L, WC), lambda n: (0, 0)),             # prelu
            pl.BlockSpec((2 * L * 3, WC, WC), lambda n: (0, 0, 0)),  # banded W
            pl.BlockSpec((2 * L, WC), lambda n: (0, 0)),             # bias
        ],
        out_specs=pl.BlockSpec((None, H, WC), lambda n: (n, 0, 0)),
        scratch_shapes=[pltpu.VMEM((H + 2, WC), jnp.float32)],
        compiler_params=pltpu.CompilerParams(
            dimension_semantics=("parallel",)),
    )(x_packed, p_all, bw_all, b_all)

    return out.reshape(N, H, W, C)


# ----------------------- deterministic parameter init ------------------------
def init_params(key, channels, layernum):
    params = []
    for _ in range(layernum):
        key, k1, k2, k3, k4 = jax.random.split(key, 5)
        params.append({
            # PReLU default: single shared parameter initialized to 0.25
            "p1": jnp.full((1,), 0.25, jnp.float32),
            "p2": jnp.full((1,), 0.25, jnp.float32),
            # conv weights as (9, Cin, Cout) = flattened HWIO
            "w1": jax.random.normal(k1, (9, channels, channels), jnp.float32) * 0.05,
            "b1": jax.random.normal(k2, (1, channels), jnp.float32) * 0.05,
            "w2": jax.random.normal(k3, (9, channels, channels), jnp.float32) * 0.05,
            "b2": jax.random.normal(k4, (1, channels), jnp.float32) * 0.05,
        })
    return params


# ----------------------------- pure-JAX reference ----------------------------
def _prelu(x, p):
    return jnp.where(x > 0, x, p * x)


def _conv3x3_ref(x, w9, b):
    C = x.shape[-1]
    w = w9.reshape(3, 3, C, C)
    y = jax.lax.conv_general_dilated(
        x, w, window_strides=(1, 1), padding="SAME",
        dimension_numbers=("NHWC", "HWIO", "NHWC"),
        precision=jax.lax.Precision.HIGHEST)
    return y + b.reshape(1, 1, 1, -1)


def _residual_block_ref(x, prm):
    a1 = _prelu(x, prm["p1"][0])
    y1 = _conv3x3_ref(a1, prm["w1"], prm["b1"])
    a2 = _prelu(y1, prm["p2"][0])
    y2 = _conv3x3_ref(a2, prm["w2"], prm["b2"])
    return x + SCALE * y2


def feature_extractor_ref(x, all_params):
    for prm in all_params:
        x = _residual_block_ref(x, prm)
    return x


if __name__ == "__main__":
    # inchannel == outchannel == 8 (required by the residual add);
    # W * C = 16 * 8 = 128 keeps the packed lane dim dense.  layernum = 3.
    N, C, H, W = 2, 8, 16, 16
    layernum = 3

    key = jax.random.PRNGKey(0)
    key, kx = jax.random.split(key)
    x_nchw = jax.random.normal(kx, (N, C, H, W), jnp.float32)  # PyTorch layout
    x = jnp.transpose(x_nchw, (0, 2, 3, 1))                    # NHWC

    all_params = init_params(key, C, layernum)

    out = jax.block_until_ready(feature_extractor(x, all_params))
    ref = jax.block_until_ready(feature_extractor_ref(x, all_params))
    np.testing.assert_allclose(np.asarray(out), np.asarray(ref),
                               rtol=1e-4, atol=1e-4)

    print("KERNEL_OK")
</pallas_src>

<mosaic_0001>
module attributes {stable_mosaic.version = 11 : i64} {
  func.func @kernel(%arg0: i32, %arg1: memref<1x16x128xf32, #tpu.memory_space<vmem>>, %arg2: memref<6x128xf32, #tpu.memory_space<vmem>>, %arg3: memref<18x128x128xf32, #tpu.memory_space<vmem>>, %arg4: memref<6x128xf32, #tpu.memory_space<vmem>>, %arg5: memref<1x16x128xf32, #tpu.memory_space<vmem>>, %arg6: memref<18x128xf32, #tpu.memory_space<vmem>>) attributes {dimension_semantics = [#tpu.dimension_semantics<parallel>], iteration_bounds = array<i64: 2>, scalar_prefetch = 0 : i64, scratch_operands = 1 : i64, tpu.core_type = #tpu.core_type<tc>, window_params = [{transform_indices = @transform_0, window_bounds = array<i64: 1, 16, 128>}, {pipeline_mode = #tpu.pipeline_mode<synchronous>, transform_indices = @transform_1, window_bounds = array<i64: 6, 128>}, {pipeline_mode = #tpu.pipeline_mode<synchronous>, transform_indices = @transform_2, window_bounds = array<i64: 18, 128, 128>}, {pipeline_mode = #tpu.pipeline_mode<synchronous>, transform_indices = @transform_3, window_bounds = array<i64: 6, 128>}, {transform_indices = @transform_4, window_bounds = array<i64: 1, 16, 128>}]} {
    %cst = arith.constant 0.000000e+00 : f32
    %0 = vector.broadcast %cst : f32 to vector<1x128xf32>
    %c0 = arith.constant 0 : index
    %c0_0 = arith.constant 0 : index
    %1 = vector.load %arg6[%c0, %c0_0] : memref<18x128xf32, #tpu.memory_space<vmem>>, vector<1x128xf32>
    tpu.vector_store %arg6[%c0, %c0_0], %0 {strides = array<i32>} : memref<18x128xf32, #tpu.memory_space<vmem>>, vector<1x128xf32>,
    %c17 = arith.constant 17 : index
    %c0_1 = arith.constant 0 : index
    %2 = vector.load %arg6[%c17, %c0_1] : memref<18x128xf32, #tpu.memory_space<vmem>>, vector<1x128xf32>
    tpu.vector_store %arg6[%c17, %c0_1], %0 {strides = array<i32>} : memref<18x128xf32, #tpu.memory_space<vmem>>, vector<1x128xf32>,
    %c0_2 = arith.constant 0 : index
    %c0_3 = arith.constant 0 : index
    %c0_4 = arith.constant 0 : index
    %3 = vector.load %arg1[%c0_2, %c0_3, %c0_4] : memref<1x16x128xf32, #tpu.memory_space<vmem>>, vector<1x16x128xf32>
    %4 = vector.shape_cast %3 : vector<1x16x128xf32> to vector<16x128xf32>
    %c0_5 = arith.constant 0 : index
    %c0_6 = arith.constant 0 : index
    %5 = vector.load %arg2[%c0_5, %c0_6] : memref<6x128xf32, #tpu.memory_space<vmem>>, vector<1x128xf32>
    %6 = vector.shape_cast %5 : vector<1x128xf32> to vector<128xf32>
    %7 = vector.shape_cast %6 : vector<128xf32> to vector<1x128xf32>
    %cst_7 = arith.constant 0.000000e+00 : f32
    %8 = vector.broadcast %cst_7 : f32 to vector<16x128xf32>
    %9 = arith.cmpf ogt, %4, %8 : vector<16x128xf32>
    %10 = vector.broadcast %7 : vector<1x128xf32> to vector<16x128xf32>
    %11 = arith.mulf %10, %4 : vector<16x128xf32>
    %12 = arith.select %9, %4, %11 : vector<16x128xi1>, vector<16x128xf32>
    %c1 = arith.constant 1 : index
    %c0_8 = arith.constant 0 : index
    %13 = vector.load %arg6[%c1, %c0_8] : memref<18x128xf32, #tpu.memory_space<vmem>>, vector<16x128xf32>
    tpu.vector_store %arg6[%c1, %c0_8], %12 {strides = array<i32>} : memref<18x128xf32, #tpu.memory_space<vmem>>, vector<16x128xf32>,
    %c1_9 = arith.constant 1 : index
    %c0_10 = arith.constant 0 : index
    %c0_11 = arith.constant 0 : index
    %14 = vector.load %arg3[%c1_9, %c0_10, %c0_11] : memref<18x128x128xf32, #tpu.memory_space<vmem>>, vector<1x128x128xf32>
    %15 = vector.shape_cast %14 : vector<1x128x128xf32> to vector<128x128xf32>
    %cst_12 = arith.constant dense<0.000000e+00> : vector<16x128xf32>
    %16 = tpu.matmul %12, %15, %cst_12 {dimension_numbers = #tpu.dot_dimension_numbers<[1], [0], [0], [1], [0, 0, 1, 1], [], []>} : vector<16x128xf32>, vector<128x128xf32>, vector<16x128xf32> -> vector<16x128xf32>
    %c0_13 = arith.constant 0 : index
    %c0_14 = arith.constant 0 : index
    %17 = vector.load %arg6[%c0_13, %c0_14] : memref<18x128xf32, #tpu.memory_space<vmem>>, vector<16x128xf32>
    %c0_15 = arith.constant 0 : index
    %c0_16 = arith.constant 0 : index
    %c0_17 = arith.constant 0 : index
    %18 = vector.load %arg3[%c0_15, %c0_16, %c0_17] : memref<18x128x128xf32, #tpu.memory_space<vmem>>, vector<1x128x128xf32>
    %19 = vector.shape_cast %18 : vector<1x128x128xf32> to vector<128x128xf32>
    %cst_18 = arith.constant dense<0.000000e+00> : vector<16x128xf32>
    %20 = tpu.matmul %17, %19, %cst_18 {dimension_numbers = #tpu.dot_dimension_numbers<[1], [0], [0], [1], [0, 0, 1, 1], [], []>} : vector<16x128xf32>, vector<128x128xf32>, vector<16x128xf32> -> vector<16x128xf32>
    %21 = arith.addf %16, %20 : vector<16x128xf32>
    %c2 = arith.constant 2 : index
    %c0_19 = arith.constant 0 : index
    %22 = vector.load %arg6[%c2, %c0_19] : memref<18x128xf32, #tpu.memory_space<vmem>>, vector<16x128xf32>
    %c2_20 = arith.constant 2 : index
    %c0_21 = arith.constant 0 : index
    %c0_22 = arith.constant 0 : index
    %23 = vector.load %arg3[%c2_20, %c0_21, %c0_22] : memref<18x128x128xf32, #tpu.memory_space<vmem>>, vector<1x128x128xf32>
    %24 = vector.shape_cast %23 : vector<1x128x128xf32> to vector<128x128xf32>
    %cst_23 = arith.constant dense<0.000000e+00> : vector<16x128xf32>
    %25 = tpu.matmul %22, %24, %cst_23 {dimension_numbers = #tpu.dot_dimension_numbers<[1], [0], [0], [1], [0, 0, 1, 1], [], []>} : vector<16x128xf32>, vector<128x128xf32>, vector<16x128xf32> -> vector<16x128xf32>
    %26 = arith.addf %21, %25 : vector<16x128xf32>
    %c0_24 = arith.constant 0 : index
    %c0_25 = arith.constant 0 : index
    %27 = vector.load %arg4[%c0_24, %c0_25] : memref<6x128xf32, #tpu.memory_space<vmem>>, vector<1x128xf32>
    %28 = vector.shape_cast %27 : vector<1x128xf32> to vector<128xf32>
    %29 = vector.shape_cast %28 : vector<128xf32> to vector<1x128xf32>
    %30 = vector.broadcast %29 : vector<1x128xf32> to vector<16x128xf32>
    %31 = arith.addf %26, %30 : vector<16x128xf32>
    %c1_26 = arith.constant 1 : index
    %c0_27 = arith.constant 0 : index
    %32 = vector.load %arg2[%c1_26, %c0_27] : memref<6x128xf32, #tpu.memory_space<vmem>>, vector<1x128xf32>
    %33 = vector.shape_cast %32 : vector<1x128xf32> to vector<128xf32>
    %34 = vector.shape_cast %33 : vector<128xf32> to vector<1x128xf32>
    %cst_28 = arith.constant 0.000000e+00 : f32
    %35 = vector.broadcast %cst_28 : f32 to vector<16x128xf32>
    %36 = arith.cmpf ogt, %31, %35 : vector<16x128xf32>
    %37 = vector.broadcast %34 : vector<1x128xf32> to vector<16x128xf32>
    %38 = arith.mulf %37, %31 : vector<16x128xf32>
    %39 = arith.select %36, %31, %38 : vector<16x128xi1>, vector<16x128xf32>
    %c1_29 = arith.constant 1 : index
    %c0_30 = arith.constant 0 : index
    %40 = vector.load %arg6[%c1_29, %c0_30] : memref<18x128xf32, #tpu.memory_space<vmem>>, vector<16x128xf32>
    tpu.vector_store %arg6[%c1_29, %c0_30], %39 {strides = array<i32>} : memref<18x128xf32, #tpu.memory_space<vmem>>, vector<16x128xf32>,
    %c4 = arith.constant 4 : index
    %c0_31 = arith.constant 0 : index
    %c0_32 = arith.constant 0 : index
    %41 = vector.load %arg3[%c4, %c0_31, %c0_32] : memref<18x128x128xf32, #tpu.memory_space<vmem>>, vector<1x128x128xf32>
    %42 = vector.shape_cast %41 : vector<1x128x128xf32> to vector<128x128xf32>
    %cst_33 = arith.constant dense<0.000000e+00> : vector<16x128xf32>
    %43 = tpu.matmul %39, %42, %cst_33 {dimension_numbers = #tpu.dot_dimension_numbers<[1], [0], [0], [1], [0, 0, 1, 1], [], []>} : vector<16x128xf32>, vector<128x128xf32>, vector<16x128xf32> -> vector<16x128xf32>
    %c0_34 = arith.constant 0 : index
    %c0_35 = arith.constant 0 : index
    %44 = vector.load %arg6[%c0_34, %c0_35] : memref<18x128xf32, #tpu.memory_space<vmem>>, vector<16x128xf32>
    %c3 = arith.constant 3 : index
    %c0_36 = arith.constant 0 : index
    %c0_37 = arith.constant 0 : index
    %45 = vector.load %arg3[%c3, %c0_36, %c0_37] : memref<18x128x128xf32, #tpu.memory_space<vmem>>, vector<1x128x128xf32>
    %46 = vector.shape_cast %45 : vector<1x128x128xf32> to vector<128x128xf32>
    %cst_38 = arith.constant dense<0.000000e+00> : vector<16x128xf32>
    %47 = tpu.matmul %44, %46, %cst_38 {dimension_numbers = #tpu.dot_dimension_numbers<[1], [0], [0], [1], [0, 0, 1, 1], [], []>} : vector<16x128xf32>, vector<128x128xf32>, vector<16x128xf32> -> vector<16x128xf32>
    %48 = arith.addf %43, %47 : vector<16x128xf32>
    %c2_39 = arith.constant 2 : index
    %c0_40 = arith.constant 0 : index
    %49 = vector.load %arg6[%c2_39, %c0_40] : memref<18x128xf32, #tpu.memory_space<vmem>>, vector<16x128xf32>
    %c5 = arith.constant 5 : index
    %c0_41 = arith.constant 0 : index
    %c0_42 = arith.constant 0 : index
    %50 = vector.load %arg3[%c5, %c0_41, %c0_42] : memref<18x128x128xf32, #tpu.memory_space<vmem>>, vector<1x128x128xf32>
    %51 = vector.shape_cast %50 : vector<1x128x128xf32> to vector<128x128xf32>
    %cst_43 = arith.constant dense<0.000000e+00> : vector<16x128xf32>
    %52 = tpu.matmul %49, %51, %cst_43 {dimension_numbers = #tpu.dot_dimension_numbers<[1], [0], [0], [1], [0, 0, 1, 1], [], []>} : vector<16x128xf32>, vector<128x128xf32>, vector<16x128xf32> -> vector<16x128xf32>
    %53 = arith.addf %48, %52 : vector<16x128xf32>
    %c1_44 = arith.constant 1 : index
    %c0_45 = arith.constant 0 : index
    %54 = vector.load %arg4[%c1_44, %c0_45] : memref<6x128xf32, #tpu.memory_space<vmem>>, vector<1x128xf32>
    %55 = vector.shape_cast %54 : vector<1x128xf32> to vector<128xf32>
    %56 = vector.shape_cast %55 : vector<128xf32> to vector<1x128xf32>
    %57 = vector.broadcast %56 : vector<1x128xf32> to vector<16x128xf32>
    %58 = arith.addf %53, %57 : vector<16x128xf32>
    %cst_46 = arith.constant 1.000000e-01 : f32
    %59 = vector.broadcast %cst_46 : f32 to vector<16x128xf32>
    %60 = arith.mulf %59, %58 : vector<16x128xf32>
    %61 = arith.addf %4, %60 : vector<16x128xf32>
    %c2_47 = arith.constant 2 : index
    %c0_48 = arith.constant 0 : index
    %62 = vector.load %arg2[%c2_47, %c0_48] : memref<6x128xf32, #tpu.memory_space<vmem>>, vector<1x128xf32>
    %63 = vector.shape_cast %62 : vector<1x128xf32> to vector<128xf32>
    %64 = vector.shape_cast %63 : vector<128xf32> to vector<1x128xf32>
    %cst_49 = arith.constant 0.000000e+00 : f32
    %65 = vector.broadcast %cst_49 : f32 to vector<16x128xf32>
    %66 = arith.cmpf ogt, %61, %65 : vector<16x128xf32>
    %67 = vector.broadcast %64 : vector<1x128xf32> to vector<16x128xf32>
    %68 = arith.mulf %67, %61 : vector<16x128xf32>
    %69 = arith.select %66, %61, %68 : vector<16x128xi1>, vector<16x128xf32>
    %c1_50 = arith.constant 1 : index
    %c0_51 = arith.constant 0 : index
    %70 = vector.load %arg6[%c1_50, %c0_51] : memref<18x128xf32, #tpu.memory_space<vmem>>, vector<16x128xf32>
    tpu.vector_store %arg6[%c1_50, %c0_51], %69 {strides = array<i32>} : memref<18x128xf32, #tpu.memory_space<vmem>>, vector<16x128xf32>,
    %c7 = arith.constant 7 : index
    %c0_52 = arith.constant 0 : index
    %c0_53 = arith.constant 0 : index
    %71 = vector.load %arg3[%c7, %c0_52, %c0_53] : memref<18x128x128xf32, #tpu.memory_space<vmem>>, vector<1x128x128xf32>
    %72 = vector.shape_cast %71 : vector<1x128x128xf32> to vector<128x128xf32>
    %cst_54 = arith.constant dense<0.000000e+00> : vector<16x128xf32>
    %73 = tpu.matmul %69, %72, %cst_54 {dimension_numbers = #tpu.dot_dimension_numbers<[1], [0], [0], [1], [0, 0, 1, 1], [], []>} : vector<16x128xf32>, vector<128x128xf32>, vector<16x128xf32> -> vector<16x128xf32>
    %c0_55 = arith.constant 0 : index
    %c0_56 = arith.constant 0 : index
    %74 = vector.load %arg6[%c0_55, %c0_56] : memref<18x128xf32, #tpu.memory_space<vmem>>, vector<16x128xf32>
    %c6 = arith.constant 6 : index
    %c0_57 = arith.constant 0 : index
    %c0_58 = arith.constant 0 : index
    %75 = vector.load %arg3[%c6, %c0_57, %c0_58] : memref<18x128x128xf32, #tpu.memory_space<vmem>>, vector<1x128x128xf32>
    %76 = vector.shape_cast %75 : vector<1x128x128xf32> to vector<128x128xf32>
    %cst_59 = arith.constant dense<0.000000e+00> : vector<16x128xf32>
    %77 = tpu.matmul %74, %76, %cst_59 {dimension_numbers = #tpu.dot_dimension_numbers<[1], [0], [0], [1], [0, 0, 1, 1], [], []>} : vector<16x128xf32>, vector<128x128xf32>, vector<16x128xf32> -> vector<16x128xf32>
    %78 = arith.addf %73, %77 : vector<16x128xf32>
    %c2_60 = arith.constant 2 : index
    %c0_61 = arith.constant 0 : index
    %79 = vector.load %arg6[%c2_60, %c0_61] : memref<18x128xf32, #tpu.memory_space<vmem>>, vector<16x128xf32>
    %c8 = arith.constant 8 : index
    %c0_62 = arith.constant 0 : index
    %c0_63 = arith.constant 0 : index
    %80 = vector.load %arg3[%c8, %c0_62, %c0_63] : memref<18x128x128xf32, #tpu.memory_space<vmem>>, vector<1x128x128xf32>
    %81 = vector.shape_cast %80 : vector<1x128x128xf32> to vector<128x128xf32>
    %cst_64 = arith.constant dense<0.000000e+00> : vector<16x128xf32>
    %82 = tpu.matmul %79, %81, %cst_64 {dimension_numbers = #tpu.dot_dimension_numbers<[1], [0], [0], [1], [0, 0, 1, 1], [], []>} : vector<16x128xf32>, vector<128x128xf32>, vector<16x128xf32> -> vector<16x128xf32>
    %83 = arith.addf %78, %82 : vector<16x128xf32>
    %c2_65 = arith.constant 2 : index
    %c0_66 = arith.constant 0 : index
    %84 = vector.load %arg4[%c2_65, %c0_66] : memref<6x128xf32, #tpu.memory_space<vmem>>, vector<1x128xf32>
    %85 = vector.shape_cast %84 : vector<1x128xf32> to vector<128xf32>
    %86 = vector.shape_cast %85 : vector<128xf32> to vector<1x128xf32>
    %87 = vector.broadcast %86 : vector<1x128xf32> to vector<16x128xf32>
    %88 = arith.addf %83, %87 : vector<16x128xf32>
    %c3_67 = arith.constant 3 : index
    %c0_68 = arith.constant 0 : index
    %89 = vector.load %arg2[%c3_67, %c0_68] : memref<6x128xf32, #tpu.memory_space<vmem>>, vector<1x128xf32>
    %90 = vector.shape_cast %89 : vector<1x128xf32> to vector<128xf32>
    %91 = vector.shape_cast %90 : vector<128xf32> to vector<1x128xf32>
    %cst_69 = arith.constant 0.000000e+00 : f32
    %92 = vector.broadcast %cst_69 : f32 to vector<16x128xf32>
    %93 = arith.cmpf ogt, %88, %92 : vector<16x128xf32>
    %94 = vector.broadcast %91 : vector<1x128xf32> to vector<16x128xf32>
    %95 = arith.mulf %94, %88 : vector<16x128xf32>
    %96 = arith.select %93, %88, %95 : vector<16x128xi1>, vector<16x128xf32>
    %c1_70 = arith.constant 1 : index
    %c0_71 = arith.constant 0 : index
    %97 = vector.load %arg6[%c1_70, %c0_71] : memref<18x128xf32, #tpu.memory_space<vmem>>, vector<16x128xf32>
    tpu.vector_store %arg6[%c1_70, %c0_71], %96 {strides = array<i32>} : memref<18x128xf32, #tpu.memory_space<vmem>>, vector<16x128xf32>,
    %c10 = arith.constant 10 : index
    %c0_72 = arith.constant 0 : index
    %c0_73 = arith.constant 0 : index
    %98 = vector.load %arg3[%c10, %c0_72, %c0_73] : memref<18x128x128xf32, #tpu.memory_space<vmem>>, vector<1x128x128xf32>
    %99 = vector.shape_cast %98 : vector<1x128x128xf32> to vector<128x128xf32>
    %cst_74 = arith.constant dense<0.000000e+00> : vector<16x128xf32>
    %100 = tpu.matmul %96, %99, %cst_74 {dimension_numbers = #tpu.dot_dimension_numbers<[1], [0], [0], [1], [0, 0, 1, 1], [], []>} : vector<16x128xf32>, vector<128x128xf32>, vector<16x128xf32> -> vector<16x128xf32>
    %c0_75 = arith.constant 0 : index
    %c0_76 = arith.constant 0 : index
    %101 = vector.load %arg6[%c0_75, %c0_76] : memref<18x128xf32, #tpu.memory_space<vmem>>, vector<16x128xf32>
    %c9 = arith.constant 9 : index
    %c0_77 = arith.constant 0 : index
    %c0_78 = arith.constant 0 : index
    %102 = vector.load %arg3[%c9, %c0_77, %c0_78] : memref<18x128x128xf32, #tpu.memory_space<vmem>>, vector<1x128x128xf32>
    %103 = vector.shape_cast %102 : vector<1x128x128xf32> to vector<128x128xf32>
    %cst_79 = arith.constant dense<0.000000e+00> : vector<16x128xf32>
    %104 = tpu.matmul %101, %103, %cst_79 {dimension_numbers = #tpu.dot_dimension_numbers<[1], [0], [0], [1], [0, 0, 1, 1], [], []>} : vector<16x128xf32>, vector<128x128xf32>, vector<16x128xf32> -> vector<16x128xf32>
    %105 = arith.addf %100, %104 : vector<16x128xf32>
    %c2_80 = arith.constant 2 : index
    %c0_81 = arith.constant 0 : index
    %106 = vector.load %arg6[%c2_80, %c0_81] : memref<18x128xf32, #tpu.memory_space<vmem>>, vector<16x128xf32>
    %c11 = arith.constant 11 : index
    %c0_82 = arith.constant 0 : index
    %c0_83 = arith.constant 0 : index
    %107 = vector.load %arg3[%c11, %c0_82, %c0_83] : memref<18x128x128xf32, #tpu.memory_space<vmem>>, vector<1x128x128xf32>
    %108 = vector.shape_cast %107 : vector<1x128x128xf32> to vector<128x128xf32>
    %cst_84 = arith.constant dense<0.000000e+00> : vector<16x128xf32>
    %109 = tpu.matmul %106, %108, %cst_84 {dimension_numbers = #tpu.dot_dimension_numbers<[1], [0], [0], [1], [0, 0, 1, 1], [], []>} : vector<16x128xf32>, vector<128x128xf32>, vector<16x128xf32> -> vector<16x128xf32>
    %110 = arith.addf %105, %109 : vector<16x128xf32>
    %c3_85 = arith.constant 3 : index
    %c0_86 = arith.constant 0 : index
    %111 = vector.load %arg4[%c3_85, %c0_86] : memref<6x128xf32, #tpu.memory_space<vmem>>, vector<1x128xf32>
    %112 = vector.shape_cast %111 : vector<1x128xf32> to vector<128xf32>
    %113 = vector.shape_cast %112 : vector<128xf32> to vector<1x128xf32>
    %114 = vector.broadcast %113 : vector<1x128xf32> to vector<16x128xf32>
    %115 = arith.addf %110, %114 : vector<16x128xf32>
    %cst_87 = arith.constant 1.000000e-01 : f32
    %116 = vector.broadcast %cst_87 : f32 to vector<16x128xf32>
    %117 = arith.mulf %116, %115 : vector<16x128xf32>
    %118 = arith.addf %61, %117 : vector<16x128xf32>
    %c4_88 = arith.constant 4 : index
    %c0_89 = arith.constant 0 : index
    %119 = vector.load %arg2[%c4_88, %c0_89] : memref<6x128xf32, #tpu.memory_space<vmem>>, vector<1x128xf32>
    %120 = vector.shape_cast %119 : vector<1x128xf32> to vector<128xf32>
    %121 = vector.shape_cast %120 : vector<128xf32> to vector<1x128xf32>
    %cst_90 = arith.constant 0.000000e+00 : f32
    %122 = vector.broadcast %cst_90 : f32 to vector<16x128xf32>
    %123 = arith.cmpf ogt, %118, %122 : vector<16x128xf32>
    %124 = vector.broadcast %121 : vector<1x128xf32> to vector<16x128xf32>
    %125 = arith.mulf %124, %118 : vector<16x128xf32>
    %126 = arith.select %123, %118, %125 : vector<16x128xi1>, vector<16x128xf32>
    %c1_91 = arith.constant 1 : index
    %c0_92 = arith.constant 0 : index
    %127 = vector.load %arg6[%c1_91, %c0_92] : memref<18x128xf32, #tpu.memory_space<vmem>>, vector<16x128xf32>
    tpu.vector_store %arg6[%c1_91, %c0_92], %126 {strides = array<i32>} : memref<18x128xf32, #tpu.memory_space<vmem>>, vector<16x128xf32>,
    %c13 = arith.constant 13 : index
    %c0_93 = arith.constant 0 : index
    %c0_94 = arith.constant 0 : index
    %128 = vector.load %arg3[%c13, %c0_93, %c0_94] : memref<18x128x128xf32, #tpu.memory_space<vmem>>, vector<1x128x128xf32>
    %129 = vector.shape_cast %128 : vector<1x128x128xf32> to vector<128x128xf32>
    %cst_95 = arith.constant dense<0.000000e+00> : vector<16x128xf32>
    %130 = tpu.matmul %126, %129, %cst_95 {dimension_numbers = #tpu.dot_dimension_numbers<[1], [0], [0], [1], [0, 0, 1, 1], [], []>} : vector<16x128xf32>, vector<128x128xf32>, vector<16x128xf32> -> vector<16x128xf32>
    %c0_96 = arith.constant 0 : index
    %c0_97 = arith.constant 0 : index
    %131 = vector.load %arg6[%c0_96, %c0_97] : memref<18x128xf32, #tpu.memory_space<vmem>>, vector<16x128xf32>
    %c12 = arith.constant 12 : index
    %c0_98 = arith.constant 0 : index
    %c0_99 = arith.constant 0 : index
    %132 = vector.load %arg3[%c12, %c0_98, %c0_99] : memref<18x128x128xf32, #tpu.memory_space<vmem>>, vector<1x128x128xf32>
    %133 = vector.shape_cast %132 : vector<1x128x128xf32> to vector<128x128xf32>
    %cst_100 = arith.constant dense<0.000000e+00> : vector<16x128xf32>
    %134 = tpu.matmul %131, %133, %cst_100 {dimension_numbers = #tpu.dot_dimension_numbers<[1], [0], [0], [1], [0, 0, 1, 1], [], []>} : vector<16x128xf32>, vector<128x128xf32>, vector<16x128xf32> -> vector<16x128xf32>
    %135 = arith.addf %130, %134 : vector<16x128xf32>
    %c2_101 = arith.constant 2 : index
    %c0_102 = arith.constant 0 : index
    %136 = vector.load %arg6[%c2_101, %c0_102] : memref<18x128xf32, #tpu.memory_space<vmem>>, vector<16x128xf32>
    %c14 = arith.constant 14 : index
    %c0_103 = arith.constant 0 : index
    %c0_104 = arith.constant 0 : index
    %137 = vector.load %arg3[%c14, %c0_103, %c0_104] : memref<18x128x128xf32, #tpu.memory_space<vmem>>, vector<1x128x128xf32>
    %138 = vector.shape_cast %137 : vector<1x128x128xf32> to vector<128x128xf32>
    %cst_105 = arith.constant dense<0.000000e+00> : vector<16x128xf32>
    %139 = tpu.matmul %136, %138, %cst_105 {dimension_numbers = #tpu.dot_dimension_numbers<[1], [0], [0], [1], [0, 0, 1, 1], [], []>} : vector<16x128xf32>, vector<128x128xf32>, vector<16x128xf32> -> vector<16x128xf32>
    %140 = arith.addf %135, %139 : vector<16x128xf32>
    %c4_106 = arith.constant 4 : index
    %c0_107 = arith.constant 0 : index
    %141 = vector.load %arg4[%c4_106, %c0_107] : memref<6x128xf32, #tpu.memory_space<vmem>>, vector<1x128xf32>
    %142 = vector.shape_cast %141 : vector<1x128xf32> to vector<128xf32>
    %143 = vector.shape_cast %142 : vector<128xf32> to vector<1x128xf32>
    %144 = vector.broadcast %143 : vector<1x128xf32> to vector<16x128xf32>
    %145 = arith.addf %140, %144 : vector<16x128xf32>
    %c5_108 = arith.constant 5 : index
    %c0_109 = arith.constant 0 : index
    %146 = vector.load %arg2[%c5_108, %c0_109] : memref<6x128xf32, #tpu.memory_space<vmem>>, vector<1x128xf32>
    %147 = vector.shape_cast %146 : vector<1x128xf32> to vector<128xf32>
    %148 = vector.shape_cast %147 : vector<128xf32> to vector<1x128xf32>
    %cst_110 = arith.constant 0.000000e+00 : f32
    %149 = vector.broadcast %cst_110 : f32 to vector<16x128xf32>
    %150 = arith.cmpf ogt, %145, %149 : vector<16x128xf32>
    %151 = vector.broadcast %148 : vector<1x128xf32> to vector<16x128xf32>
    %152 = arith.mulf %151, %145 : vector<16x128xf32>
    %153 = arith.select %150, %145, %152 : vector<16x128xi1>, vector<16x128xf32>
    %c1_111 = arith.constant 1 : index
    %c0_112 = arith.constant 0 : index
    %154 = vector.load %arg6[%c1_111, %c0_112] : memref<18x128xf32, #tpu.memory_space<vmem>>, vector<16x128xf32>
    tpu.vector_store %arg6[%c1_111, %c0_112], %153 {strides = array<i32>} : memref<18x128xf32, #tpu.memory_space<vmem>>, vector<16x128xf32>,
    %c16 = arith.constant 16 : index
    %c0_113 = arith.constant 0 : index
    %c0_114 = arith.constant 0 : index
    %155 = vector.load %arg3[%c16, %c0_113, %c0_114] : memref<18x128x128xf32, #tpu.memory_space<vmem>>, vector<1x128x128xf32>
    %156 = vector.shape_cast %155 : vector<1x128x128xf32> to vector<128x128xf32>
    %cst_115 = arith.constant dense<0.000000e+00> : vector<16x128xf32>
    %157 = tpu.matmul %153, %156, %cst_115 {dimension_numbers = #tpu.dot_dimension_numbers<[1], [0], [0], [1], [0, 0, 1, 1], [], []>} : vector<16x128xf32>, vector<128x128xf32>, vector<16x128xf32> -> vector<16x128xf32>
    %c0_116 = arith.constant 0 : index
    %c0_117 = arith.constant 0 : index
    %158 = vector.load %arg6[%c0_116, %c0_117] : memref<18x128xf32, #tpu.memory_space<vmem>>, vector<16x128xf32>
    %c15 = arith.constant 15 : index
    %c0_118 = arith.constant 0 : index
    %c0_119 = arith.constant 0 : index
    %159 = vector.load %arg3[%c15, %c0_118, %c0_119] : memref<18x128x128xf32, #tpu.memory_space<vmem>>, vector<1x128x128xf32>
    %160 = vector.shape_cast %159 : vector<1x128x128xf32> to vector<128x128xf32>
    %cst_120 = arith.constant dense<0.000000e+00> : vector<16x128xf32>
    %161 = tpu.matmul %158, %160, %cst_120 {dimension_numbers = #tpu.dot_dimension_numbers<[1], [0], [0], [1], [0, 0, 1, 1], [], []>} : vector<16x128xf32>, vector<128x128xf32>, vector<16x128xf32> -> vector<16x128xf32>
    %162 = arith.addf %157, %161 : vector<16x128xf32>
    %c2_121 = arith.constant 2 : index
    %c0_122 = arith.constant 0 : index
    %163 = vector.load %arg6[%c2_121, %c0_122] : memref<18x128xf32, #tpu.memory_space<vmem>>, vector<16x128xf32>
    %c17_123 = arith.constant 17 : index
    %c0_124 = arith.constant 0 : index
    %c0_125 = arith.constant 0 : index
    %164 = vector.load %arg3[%c17_123, %c0_124, %c0_125] : memref<18x128x128xf32, #tpu.memory_space<vmem>>, vector<1x128x128xf32>
    %165 = vector.shape_cast %164 : vector<1x128x128xf32> to vector<128x128xf32>
    %cst_126 = arith.constant dense<0.000000e+00> : vector<16x128xf32>
    %166 = tpu.matmul %163, %165, %cst_126 {dimension_numbers = #tpu.dot_dimension_numbers<[1], [0], [0], [1], [0, 0, 1, 1], [], []>} : vector<16x128xf32>, vector<128x128xf32>, vector<16x128xf32> -> vector<16x128xf32>
    %167 = arith.addf %162, %166 : vector<16x128xf32>
    %c5_127 = arith.constant 5 : index
    %c0_128 = arith.constant 0 : index
    %168 = vector.load %arg4[%c5_127, %c0_128] : memref<6x128xf32, #tpu.memory_space<vmem>>, vector<1x128xf32>
    %169 = vector.shape_cast %168 : vector<1x128xf32> to vector<128xf32>
    %170 = vector.shape_cast %169 : vector<128xf32> to vector<1x128xf32>
    %171 = vector.broadcast %170 : vector<1x128xf32> to vector<16x128xf32>
    %172 = arith.addf %167, %171 : vector<16x128xf32>
    %cst_129 = arith.constant 1.000000e-01 : f32
    %173 = vector.broadcast %cst_129 : f32 to vector<16x128xf32>
    %174 = arith.mulf %173, %172 : vector<16x128xf32>
    %175 = arith.addf %118, %174 : vector<16x128xf32>
    %c0_130 = arith.constant 0 : index
    %c0_131 = arith.constant 0 : index
    %c0_132 = arith.constant 0 : index
    %176 = vector.load %arg5[%c0_130, %c0_131, %c0_132] : memref<1x16x128xf32, #tpu.memory_space<vmem>>, vector<1x16x128xf32>
    %177 = vector.shape_cast %176 : vector<1x16x128xf32> to vector<16x128xf32>
    %178 = vector.shape_cast %175 : vector<16x128xf32> to vector<1x16x128xf32>
    tpu.vector_store %arg5[%c0_130, %c0_131, %c0_132], %178 {strides = array<i32>} : memref<1x16x128xf32, #tpu.memory_space<vmem>>, vector<1x16x128xf32>,
    return
  }
  func.func @transform_0(%arg0: i32) -> (i32, i32, i32) {
    %c0_i32 = arith.constant 0 : i32
    %c0_i32_0 = arith.constant 0 : i32
    %c0_i32_1 = arith.constant 0 : i32
    return %arg0, %c0_i32, %c0_i32_0 : i32, i32, i32
  }
  func.func @transform_1(%arg0: i32) -> (i32, i32) {
    %c0_i32 = arith.constant 0 : i32
    %c0_i32_0 = arith.constant 0 : i32
    %c0_i32_1 = arith.constant 0 : i32
    return %c0_i32, %c0_i32_0 : i32, i32
  }
  func.func @transform_2(%arg0: i32) -> (i32, i32, i32) {
    %c0_i32 = arith.constant 0 : i32
    %c0_i32_0 = arith.constant 0 : i32
    %c0_i32_1 = arith.constant 0 : i32
    %c0_i32_2 = arith.constant 0 : i32
    return %c0_i32, %c0_i32_0, %c0_i32_1 : i32, i32, i32
  }
  func.func @transform_3(%arg0: i32) -> (i32, i32) {
    %c0_i32 = arith.constant 0 : i32
    %c0_i32_0 = arith.constant 0 : i32
    %c0_i32_1 = arith.constant 0 : i32
    return %c0_i32, %c0_i32_0 : i32, i32
  }
  func.func @transform_4(%arg0: i32) -> (i32, i32, i32) {
    %c0_i32 = arith.constant 0 : i32
    %c0_i32_0 = arith.constant 0 : i32
    %c0_i32_1 = arith.constant 0 : i32
    return %arg0, %c0_i32, %c0_i32_0 : i32, i32, i32
  }
}

</mosaic_0001>

<bundles_post_ra>
// kernel: tile.26
= control target key start
LH: loop header
LB: loop body
LE: loop exit
PB: predicated region body
PF: predicated region fallthrough
CT: control target
= control target key end

     0   :  { %s28_s0 = inlined_call_operand.vmem [shape: f32[8], index: 0, kind: input, shape index: {}]   ;;  %s29_s1 = inlined_call_operand.vmem [shape: f32[16,8], index: 1, kind: output, shape index: {}]  }
   0x1   :  { %v4_v0 = vld [vmem:[%s28_s0] ss:$0 sm:$0xff] }
   0x2   :  { %5 = vst [vmem:[%s29_s1] sm:$0xff] %v4_v0  ;;  %8 = vst [vmem:[%s29_s1 + $0x8] sm:$0xff] %v4_v0 }

// kernel: tile.42
= control target key start
LH: loop header
LB: loop body
LE: loop exit
PB: predicated region body
PF: predicated region fallthrough
CT: control target
= control target key end

     0   :  { %s131_s10 = smov 120   ;;  %s132_s11 = smov 104   ;;  %vm3_vm0 = vcmask 64512   ;;  %vm9_vm1 = vcmask 1048512   ;;  %vm15_vm2 = vcmask 982912   ;;  %vm21_vm3 = vcmask 917312   ;;  %s207_s0 = inlined_call_operand.vmem [shape: f32[16,8], index: 0, kind: input, shape index: {}]   ;;  %s208_s1 = inlined_call_operand.vmem [shape: f32[1,128], index: 1, kind: output, shape index: {}]  }
   0x1   :  { %v101_v0 = vld [vmem:[%s207_s0 + $0xf] sm:$0x1]   ;;  %v103_v1 = vld [vmem:[%s207_s0 + $0xd] sm:$0x1]   ;;  %v102_v2 = vld [vmem:[%s207_s0 + $0xe] sm:$0x1]  }
   0x2   :  { %7 = vrot.lane.b32.xlu0 %v101_v0, %s131_s10  ;;  %19 = vrot.lane.b32.xlu1 %v103_v1, %s132_s11  ;;  %v104_v3 = vld [vmem:[%s207_s0 + $0xc] sm:$0x1]   ;;  %s133_s16 = smov 112   ;;  %s134_s17 = smov 96   ;;  %v105_v4 = vld [vmem:[%s207_s0 + $0xb] sm:$0x1]  }
   0x3   :  { %v106_v5 = vld [vmem:[%s207_s0 + $0xa] sm:$0x1]   ;;  %v2_v6 = vld [vmem:[%s207_s0] sm:$0x1]   ;;  %s135_s24 = smov 88   ;;  %s136_s25 = smov 80  }
   0x4   :  { %4 = vst.msk [vmem:[#allocation0] sm:$0x1] %vm3_vm0, %v2_v6   ;;  %v107_v7 = vld [vmem:[%s207_s0 + $0x9] sm:$0x1]   ;;  %v108_v8 = vld [vmem:[%s207_s0 + $0x8] sm:$0x1]  }
   0x5   :  { %s137_s30 = smov 72   ;;  %s138_s2 = smov 64   ;;  %v109_v9 = vld [vmem:[%s207_s0 + $0x7] sm:$0x1]   ;;  %v110_v10 = vld [vmem:[%s207_s0 + $0x6] sm:$0x1]  }
   0x6   :  { %13 = vrot.lane.b32.xlu0 %v102_v2, %s133_s16  ;;  %25 = vrot.lane.b32.xlu1 %v104_v3, %s134_s17  ;;  %s139_s7 = smov 56   ;;  %s140_s8 = smov 48   ;;  %v111_v11 = vld [vmem:[%s207_s0 + $0x5] sm:$0x1]   ;;  %v112_v12 = vld [vmem:[%s207_s0 + $0x4] sm:$0x1]  }
   0x7   :  { %s141_s13 = smov 40   ;;  %s142_s14 = smov 32   ;;  %v113_v13 = vld [vmem:[%s207_s0 + $0x3] sm:$0x1]   ;;  %v114_v14 = vld [vmem:[%s207_s0 + $0x2] sm:$0x1]  }
   0x8   :  { %s143_s19 = smov 24   ;;  %s144_s20 = smov 16   ;;  %v115_v15 = vld [vmem:[%s207_s0 + $0x1] sm:$0x1]   ;;  %vm27_vm4 = vcmask 851712   ;;  %vm33_vm5 = vcmask 786112  }
   0x9   :  { %s145_s0 = smov 8   ;;  %vm39_vm6 = vcmask 720512   ;;  %vm45_vm7 = vcmask 654912   ;;  %vm51_vm8 = vcmask 589312   ;;  %vm57_vm9 = vcmask 523712  }
   0xa   :  { %31 = vrot.lane.b32.xlu0 %v105_v4, %s135_s24  ;;  %37 = vrot.lane.b32.xlu1 %v106_v5, %s136_s25  ;;  %vm63_vm10 = vcmask 458112   ;;  %vm69_vm11 = vcmask 392512   ;;  %vm75_vm12 = vcmask 326912   ;;  %vm81_vm13 = vcmask 261312  }
   0xb   :  { %vm87_vm14 = vcmask 195712   ;;  %vm93_vm15 = vcmask 130112  }
   0xe   :  { %43 = vrot.lane.b32.xlu0 %v107_v7, %s137_s30  ;;  %49 = vrot.lane.b32.xlu1 %v108_v8, %s138_s2 }
  0x12   :  { %55 = vrot.lane.b32.xlu0 %v109_v9, %s139_s7  ;;  %61 = vrot.lane.b32.xlu1 %v110_v10, %s140_s8 }
  0x16   :  { %67 = vrot.lane.b32.xlu0 %v111_v11, %s141_s13  ;;  %73 = vrot.lane.b32.xlu1 %v112_v12, %s142_s14 }
  0x1a   :  { %79 = vrot.lane.b32.xlu0 %v113_v13, %s143_s19  ;;  %85 = vrot.lane.b32.xlu1 %v114_v14, %s144_s20 }
  0x1e   :  { %91 = vrot.lane.b32.xlu0 %v115_v15, %s145_s0 }
  0x74   :  { %v8_v16 = vpop.permute.xlu0 %7   ;;  %v20_v17 = vpop.permute.xlu1 %19  }
  0x75   :  { %10 = vst.msk [vmem:[#allocation0] sm:$0x1] %vm9_vm1, %v8_v16  }
  0x78   :  { %v14_v18 = vpop.permute.xlu0 %13   ;;  %v26_v19 = vpop.permute.xlu1 %25  }
  0x79   :  { %16 = vst.msk [vmem:[#allocation0] sm:$0x1] %vm15_vm2, %v14_v18  }
  0x7a   :  { %22 = vst.msk [vmem:[#allocation0] sm:$0x1] %vm21_vm3, %v20_v17  }
  0x7b   :  { %28 = vst.msk [vmem:[#allocation0] sm:$0x1] %vm27_vm4, %v26_v19  }
  0x7c   :  { %v32_v20 = vpop.permute.xlu0 %31   ;;  %v38_v21 = vpop.permute.xlu1 %37  }
  0x7d   :  { %34 = vst.msk [vmem:[#allocation0] sm:$0x1] %vm33_vm5, %v32_v20  }
  0x7e   :  { %40 = vst.msk [vmem:[#allocation0] sm:$0x1] %vm39_vm6, %v38_v21  }
  0x80   :  { %v44_v22 = vpop.permute.xlu0 %43   ;;  %v50_v23 = vpop.permute.xlu1 %49  }
  0x81   :  { %46 = vst.msk [vmem:[#allocation0] sm:$0x1] %vm45_vm7, %v44_v22  }
  0x82   :  { %52 = vst.msk [vmem:[#allocation0] sm:$0x1] %vm51_vm8, %v50_v23  }
  0x84   :  { %v56_v24 = vpop.permute.xlu0 %55   ;;  %v62_v25 = vpop.permute.xlu1 %61  }
  0x85   :  { %58 = vst.msk [vmem:[#allocation0] sm:$0x1] %vm57_vm9, %v56_v24  }
  0x86   :  { %64 = vst.msk [vmem:[#allocation0] sm:$0x1] %vm63_vm10, %v62_v25  }
  0x88   :  { %v68_v26 = vpop.permute.xlu0 %67   ;;  %v74_v27 = vpop.permute.xlu1 %73  }
  0x89   :  { %70 = vst.msk [vmem:[#allocation0] sm:$0x1] %vm69_vm11, %v68_v26  }
  0x8a   :  { %76 = vst.msk [vmem:[#allocation0] sm:$0x1] %vm75_vm12, %v74_v27  }
  0x8c   :  { %v80_v28 = vpop.permute.xlu0 %79   ;;  %v86_v29 = vpop.permute.xlu1 %85  }
  0x8d   :  { %82 = vst.msk [vmem:[#allocation0] sm:$0x1] %vm81_vm13, %v80_v28  }
  0x8e   :  { %88 = vst.msk [vmem:[#allocation0] sm:$0x1] %vm87_vm14, %v86_v29  }
  0x90   :  { %v92_v30 = vpop.permute.xlu0 %91  }
  0x91   :  { %94 = vst.msk [vmem:[#allocation0] sm:$0x1] %vm93_vm15, %v92_v30  }
  0x98   :  { %v98_v31 = vld [vmem:[#allocation0] sm:$0x1] }
  0x99   :  { %100 = vst [vmem:[%s208_s1] sm:$0x1] %v98_v31 }

// kernel: feature_extractor.1
= control target key start
LH: loop header
LB: loop body
LE: loop exit
PB: predicated region body
PF: predicated region fallthrough
CT: control target
= control target key end

     0   :  { %s3976_s15 = smov 0   ;;  %s4944_s0 = inlined_call_operand.vmem [shape: f32[2,16,128], index: 0, kind: input, shape index: {}]   ;;  %s4945_s1 = inlined_call_operand.vmem [shape: f32[6,128], index: 1, kind: input, shape index: {}]   ;;  %s4946_s2 = inlined_call_operand.vmem [shape: f32[18,128,128], index: 2, kind: input, shape index: {}]   ;;  %s4947_s3 = inlined_call_operand.vmem [shape: f32[6,128], index: 3, kind: input, shape index: {}]   ;;  %s4948_s4 = inlined_call_operand.vmem [shape: f32[2,16,128], index: 4, kind: output, shape index: {}]  }
   0x1 LB: > { %s2082_s16 = sadd.s32 4294967295, %s3948_s15   ;;  %p2086_p0 = scmp.ge.s32.totalorder %s3948_s15, 1  ;;  %s3948_s15 = sphi %s3976_s15, %s14_s15  }
   0x2   : > { %p162_p1 = scmp.lt.s32.totalorder %s3948_s15, 3 }
   0x4   : > { %p163_p2 = pnand %p2086_p0, %p162_p1 }
   0x5   : > { %v234_v0 = vld [vmem:[%s4946_s2] sm:$0xff] (!%p163_p2)  ;;  %v235_v1 = vld [vmem:[%s4946_s2 + $0x8] sm:$0xff] (!%p163_p2)  ;;  %v236_v2 = vld [vmem:[%s4946_s2 + $0x10] sm:$0xff] (!%p163_p2)  ;;  %p188_p3 = scmp.lt.s32.totalorder (!%p163_p2), %s2082_s16, 1  ;;  %v3950_v5 = vmov (!%p163_p2), 0.0  }
   0x6   : > { %166 = sbr.rel (%p163_p2) target bundleno = 1787 (0x6fb), region = 36  ;;  %v3333_v3 = vpack.c.bf16 (!%p163_p2), %v235_v1, %v234_v0  ;;  %v237_v4 = vld [vmem:[%s4946_s2 + $0x18] sm:$0xff] (!%p163_p2)  ;;  %198 = vst [vmem:[#allocation2] sm:$0x1] (!%p163_p2), %v3950_v5  ;;  %199 = vst [vmem:[#allocation2 + $0x11] sm:$0x1] (!%p163_p2), %v3950_v5 }
   0x7   : > { %v3337_v6 = vpack.c.bf16 (!%p163_p2), %v237_v4, %v236_v2  ;;  %v238_v7 = vld [vmem:[%s4946_s2 + $0x20] sm:$0xff] (!%p163_p2)  ;;  %v239_v8 = vld [vmem:[%s4946_s2 + $0x28] sm:$0xff] (!%p163_p2)  ;;  %v240_v10 = vld [vmem:[%s4946_s2 + $0x30] sm:$0xff] (!%p163_p2) }
   0x8   : > { %3334 = vmatprep.subr.bf16.mxu0 (!%p163_p2), %v3333_v3  ;;  %v3341_v9 = vpack.c.bf16 (!%p163_p2), %v239_v8, %v238_v7  ;;  %v2091_v11 = vld [vmem:[%s4945_s1] ss:$0 sm:$0xff] (!%p163_p2)  ;;  %v241_v12 = vld [vmem:[%s4946_s2 + $0x38] sm:$0xff] (!%p163_p2)  ;;  %v243_v21 = vld [vmem:[%s4946_s2 + $0x48] sm:$0xff] (!%p163_p2) }
   0x9   : > { %3336 = vmatpush3.bf16.msra.mxu0 (!%p163_p2), %v3333_v3  ;;  %v3345_v17 = vpack.c.bf16 (!%p163_p2), %v241_v12, %v240_v10  ;;  %v242_v20 = vld [vmem:[%s4946_s2 + $0x40] sm:$0xff] (!%p163_p2)  ;;  %v244_v23 = vld [vmem:[%s4946_s2 + $0x50] sm:$0xff] (!%p163_p2)  ;;  %v245_v24 = vld [vmem:[%s4946_s2 + $0x58] sm:$0xff] (!%p163_p2) }
   0xa   : > { %3338 = vmatprep.subr.bf16.mxu0 (!%p163_p2), %v3337_v6  ;;  %v3349_v22 = vpack.c.bf16 (!%p163_p2), %v243_v21, %v242_v20  ;;  %v3353_v25 = vpack.c.bf16 (!%p163_p2), %v245_v24, %v244_v23  ;;  %v246_v26 = vld [vmem:[%s4946_s2 + $0x60] sm:$0xff] (!%p163_p2)  ;;  %v247_v28 = vld [vmem:[%s4946_s2 + $0x68] sm:$0xff] (!%p163_p2)  ;;  %v2144_v32 = vld [vmem:[%s4946_s2 + $0x190] sm:$0xff] (!%p163_p2) }
   0xb   : > { %v2142_v29 = vld [vmem:[%s4946_s2 + $0x180] sm:$0xff] (!%p163_p2)  ;;  %v2143_v30 = vld [vmem:[%s4946_s2 + $0x188] sm:$0xff] (!%p163_p2)  ;;  %v2145_v33 = vld [vmem:[%s4946_s2 + $0x198] sm:$0xff] (!%p163_p2)  ;;  %v3357_v37 = vpack.c.bf16 (!%p163_p2), %v247_v28, %v246_v26 }
   0xc   : > { %v3429_v31 = vpack.c.bf16 (!%p163_p2), %v2143_v30, %v2142_v29  ;;  %v3433_v34 = vpack.c.bf16 (!%p163_p2), %v2145_v33, %v2144_v32  ;;  %v2146_v35 = vld [vmem:[%s4946_s2 + $0x1a0] sm:$0xff] (!%p163_p2)  ;;  %v2147_v36 = vld [vmem:[%s4946_s2 + $0x1a8] sm:$0xff] (!%p163_p2)  ;;  %v248_v38 = vld [vmem:[%s4946_s2 + $0x70] sm:$0xff] (!%p163_p2) }
   0xd   : > { %s4950_s16 = smov (!%p188_p3, %s2082_s16), 1  ;;  %3340 = vmatpush3.bf16.msra.mxu0 %v3337_v6  ;;  %v249_v39 = vld [vmem:[%s4946_s2 + $0x78] sm:$0xff]  ;;  %v3437_v40 = vpack.c.bf16 %v2147_v36, %v2146_v35  ;;  %v2148_v41 = vld [vmem:[%s4946_s2 + $0x1b0] sm:$0xff]  ;;  %v2092_v44 = vld [vmem:[%s4946_s2 + $0x80] sm:$0xff] }
   0xe   : > { %s2377_s29 = sshll.u32 %s4950_s16, 4  ;;  %3342 = vmatprep.subr.bf16.mxu0 %v3341_v9  ;;  %3430 = vmatprep.subr.bf16.mxu1 %v3429_v31  ;;  %v2149_v42 = vld [vmem:[%s4946_s2 + $0x1b8] sm:$0xff]  ;;  %v3361_v43 = vpack.c.bf16 %v249_v39, %v248_v38  ;;  %v2093_v45 = vld [vmem:[%s4946_s2 + $0x88] sm:$0xff]  ;;  %v2150_v47 = vld [vmem:[%s4946_s2 + $0x1c0] sm:$0xff] }
   0xf   : > { %s192_s8 = scalar_lea.vmem %s4944_s0, %s2377_s29  ;;  %3432 = vmatpush3.bf16.msra.mxu1 %v3429_v31  ;;  %v3441_v46 = vpack.c.bf16 %v2149_v42, %v2148_v41  ;;  %v2151_v48 = vld [vmem:[%s4946_s2 + $0x1c8] sm:$0xff]  ;;  %v3365_v49 = vpack.c.bf16 %v2093_v45, %v2092_v44  ;;  %v2094_v50 = vld [vmem:[%s4946_s2 + $0x90] sm:$0xff]  ;;  %v2095_v51 = vld [vmem:[%s4946_s2 + $0x98] sm:$0xff]  ;;  %s197_s24 = scalar_lea.vmem %s4948_s4, %s2377_s29 }
  0x10   : > { %v4019_v13 = vld [vmem:[%s192_s8] sm:$0xff]  ;;  %v4021_v14 = vld [vmem:[%s192_s8 + $0x8] sm:$0xff]  ;;  %3434 = vmatprep.subr.bf16.mxu1 %v3433_v34  ;;  %v3445_v52 = vpack.c.bf16 %v2151_v48, %v2150_v47  ;;  %v3369_v54 = vpack.c.bf16 %v2095_v51, %v2094_v50  ;;  %v2098_v58 = vld [vmem:[%s4946_s2 + $0xb0] sm:$0xff] }
  0x11   : > { %vm203_vm0 = vcmp.gt.f32.partialorder %v4019_v13, 0.0  ;;  %vm204_vm1 = vcmp.gt.f32.partialorder %v4021_v14, 0.0  ;;  %v209_v15 = vmul.f32 %v2091_v11, %v4019_v13  ;;  %v210_v16 = vmul.f32 %v2091_v11, %v4021_v14  ;;  %3344 = vmatpush3.bf16.msra.mxu0 %v3341_v9  ;;  %v2096_v55 = vld [vmem:[%s4946_s2 + $0xa0] sm:$0xff]  ;;  %v2097_v56 = vld [vmem:[%s4946_s2 + $0xa8] sm:$0xff]  ;;  %v2099_v59 = vld [vmem:[%s4946_s2 + $0xb8] sm:$0xff] }
  0x12   : > { %3346 = vmatprep.subr.bf16.mxu0 %v3345_v17  ;;  %v3373_v57 = vpack.c.bf16 %v2097_v56, %v2096_v55  ;;  %v3377_v60 = vpack.c.bf16 %v2099_v59, %v2098_v58  ;;  %v2100_v61 = vld [vmem:[%s4946_s2 + $0xc0] sm:$0xff]  ;;  %v2101_v62 = vld [vmem:[%s4946_s2 + $0xc8] sm:$0xff]  ;;  %v2102_v0 = vld [vmem:[%s4946_s2 + $0xd0] sm:$0xff] }
  0x13   : > { %v4028_v18 = vsel %vm203_vm0, %v4019_v13, %v209_v15  ;;  %v4031_v19 = vsel %vm204_vm1, %v4021_v14, %v210_v16  ;;  %3436 = vmatpush3.bf16.msra.mxu1 %v3433_v34  ;;  %v3381_v63 = vpack.c.bf16 %v2101_v62, %v2100_v61  ;;  %v2103_v1 = vld [vmem:[%s4946_s2 + $0xd8] sm:$0xff]  ;;  %v2104_v3 = vld [vmem:[%s4946_s2 + $0xe0] sm:$0xff]  ;;  %v2105_v4 = vld [vmem:[%s4946_s2 + $0xe8] sm:$0xff] }
  0x14   : > { %213 = vst [vmem:[#allocation2 + $0x1] sm:$0xff] %v4028_v18  ;;  %214 = vst [vmem:[#allocation2 + $0x9] sm:$0xff] %v4031_v19  ;;  %3438 = vmatprep.subr.bf16.mxu1 %v3437_v40  ;;  %v3385_v2 = vpack.c.bf16 %v2103_v1, %v2102_v0  ;;  %v3389_v5 = vpack.c.bf16 %v2105_v4, %v2104_v3  ;;  %v2106_v6 = vld [vmem:[%s4946_s2 + $0xf0] sm:$0xff]  ;;  %v2107_v7 = vld [vmem:[%s4946_s2 + $0xf8] sm:$0xff] }
  0x15   : > { %3348 = vmatpush3.bf16.msra.mxu0 %v3345_v17  ;;  %v3393_v8 = vpack.c.bf16 %v2107_v7, %v2106_v6  ;;  %v2108_v9 = vld [vmem:[%s4946_s2 + $0x100] sm:$0xff]  ;;  %v2109_v10 = vld [vmem:[%s4946_s2 + $0x108] sm:$0xff]  ;;  %v2110_v12 = vld [vmem:[%s4946_s2 + $0x110] sm:$0xff] }
  0x16   : > { %3350 = vmatprep.subr.bf16.mxu0 %v3349_v22  ;;  %v3397_v11 = vpack.c.bf16 %v2109_v10, %v2108_v9  ;;  %v2111_v15 = vld [vmem:[%s4946_s2 + $0x118] sm:$0xff]  ;;  %v2113_v20 = vld [vmem:[%s4946_s2 + $0x128] sm:$0xff]  ;;  %v2120_v30 = vld [vmem:[%s4946_s2 + $0x160] sm:$0xff] }
  0x17   : > { %3440 = vmatpush3.bf16.msra.mxu1 %v3437_v40  ;;  %v3401_v16 = vpack.c.bf16 %v2111_v15, %v2110_v12  ;;  %v2115_v23 = vld [vmem:[%s4946_s2 + $0x138] sm:$0xff]  ;;  %v2121_v31 = vld [vmem:[%s4946_s2 + $0x168] sm:$0xff]  ;;  %v2122_v33 = vld [vmem:[%s4946_s2 + $0x170] sm:$0xff] }
  0x18   : > { %3442 = vmatprep.subr.bf16.mxu1 %v3441_v46  ;;  %v2119_v28 = vld [vmem:[%s4946_s2 + $0x158] sm:$0xff]  ;;  %v3421_v32 = vpack.c.bf16 %v2121_v31, %v2120_v30  ;;  %v2154_v40 = vld [vmem:[%s4946_s2 + $0x1e0] sm:$0xff]  ;;  %v2155_v41 = vld [vmem:[%s4946_s2 + $0x1e8] sm:$0xff] }
  0x19   : > { %3352 = vmatpush3.bf16.msra.mxu0 %v3349_v22  ;;  %v2114_v22 = vld [vmem:[%s4946_s2 + $0x130] sm:$0xff]  ;;  %v2123_v34 = vld [vmem:[%s4946_s2 + $0x178] sm:$0xff]  ;;  %v3453_v42 = vpack.c.bf16 %v2155_v41, %v2154_v40  ;;  %v2127_v47 = vld [vmem:[%s4946_s2 + $0x208] sm:$0xff] }
  0x1a   : > { %3354 = vmatprep.subr.bf16.mxu0 %v3353_v25  ;;  %v3409_v24 = vpack.c.bf16 %v2115_v23, %v2114_v22  ;;  %v3425_v35 = vpack.c.bf16 %v2123_v34, %v2122_v33  ;;  %v2153_v38 = vld [vmem:[%s4946_s2 + $0x1d8] sm:$0xff]  ;;  %v2193_v50 = vld [vmem:[%s4946_s2 + $0x308] sm:$0xff]  ;;  %v2194_v51 = vld [vmem:[%s4946_s2 + $0x310] sm:$0xff] }
  0x1b   : > { %v232_v27 = vld [vmem:[#allocation2] sm:$0xff]  ;;  %v233_v53 = vld [vmem:[#allocation2 + $0x8] sm:$0xff]  ;;  %3444 = vmatpush3.bf16.msra.mxu1 %v3441_v46  ;;  %v2157_v44 = vld [vmem:[%s4946_s2 + $0x1f8] sm:$0xff] }
  0x1c   : > { %2735 = vmatprep.mubr.f32.mxu0 %v232_v27  ;;  %3446 = vmatprep.subr.bf16.mxu1 %v3445_v52  ;;  %v400_v17 = vld [vmem:[#allocation2 + $0x2] sm:$0xff]  ;;  %v2118_v27 = vld [vmem:[%s4946_s2 + $0x150] sm:$0xff]  ;;  %v2199_v59 = vld [vmem:[%s4946_s2 + $0x338] sm:$0xff] }
  0x1d   : > { %3356 = vmatpush3.bf16.msra.mxu0 %v3353_v25  ;;  %v2116_v25 = vld [vmem:[%s4946_s2 + $0x140] sm:$0xff]  ;;  %v3417_v29 = vpack.c.bf16 %v2119_v28, %v2118_v27  ;;  %v401_v36 = vld [vmem:[#allocation2 + $0xa] sm:$0xff]  ;;  %v2141_v30 = vld [vmem:[%s4946_s2 + $0x278] sm:$0xff] }
  0x1e   : > { %3358 = vmatprep.subr.bf16.mxu0 %v3357_v37  ;;  %v2126_v46 = vld [vmem:[%s4946_s2 + $0x200] sm:$0xff]  ;;  %v2197_v56 = vld [vmem:[%s4946_s2 + $0x328] sm:$0xff]  ;;  %v2198_v58 = vld [vmem:[%s4946_s2 + $0x330] sm:$0xff] }
  0x1f   : > { %3448 = vmatpush3.bf16.msra.mxu1 %v3445_v52  ;;  %v3461_v48 = vpack.c.bf16 %v2127_v47, %v2126_v46  ;;  %v2196_v55 = vld [vmem:[%s4946_s2 + $0x320] sm:$0xff]  ;;  %v2128_v7 = vld [vmem:[%s4946_s2 + $0x210] sm:$0xff]  ;;  %v2131_v15 = vld [vmem:[%s4946_s2 + $0x228] sm:$0xff] }
  0x20   : > { %v2124_v61 = vld [vmem:[%s4947_s3] ss:$0 sm:$0xff]  ;;  %v2135_v22 = vld [vmem:[%s4946_s2 + $0x248] sm:$0xff] }
  0x21   : > { %3360 = vmatpush3.bf16.msra.mxu0 %v3357_v37  ;;  %v2152_v37 = vld [vmem:[%s4946_s2 + $0x1d0] sm:$0xff]  ;;  %v2130_v12 = vld [vmem:[%s4946_s2 + $0x220] sm:$0xff]  ;;  %v2139_v27 = vld [vmem:[%s4946_s2 + $0x268] sm:$0xff] }
  0x22   : > { %3362 = vmatprep.subr.bf16.mxu0 %v3361_v43  ;;  %v3449_v39 = vpack.c.bf16 %v2153_v38, %v2152_v37  ;;  %v2159_v33 = vld [vmem:[%s4946_s2 + $0x288] sm:$0xff]  ;;  %v2162_v38 = vld [vmem:[%s4946_s2 + $0x2a0] sm:$0xff] }
  0x23   : > { %v2167_v46 = vld [vmem:[%s4946_s2 + $0x2c8] sm:$0xff] }
  0x24   : > { %3450 = vmatprep.subr.bf16.mxu1 %v3449_v39 }
  0x25   : > { %3364 = vmatpush3.bf16.msra.mxu0 %v3361_v43  ;;  %3452 = vmatpush3.bf16.msra.mxu1 %v3449_v39  ;;  %v2156_v43 = vld [vmem:[%s4946_s2 + $0x1f0] sm:$0xff]  ;;  %v2163_v39 = vld [vmem:[%s4946_s2 + $0x2a8] sm:$0xff] }
  0x26   : > { %3366 = vmatprep.subr.bf16.mxu0 %v3365_v49  ;;  %3454 = vmatprep.subr.bf16.mxu1 %v3453_v42  ;;  %v3457_v45 = vpack.c.bf16 %v2157_v44, %v2156_v43  ;;  %v3501_v41 = vpack.c.bf16 %v2163_v39, %v2162_v38  ;;  %v2165_v43 = vld [vmem:[%s4946_s2 + $0x2b8] sm:$0xff] }
  0x28   : > { %2736 = vmatmul.mubr.f32.vlgmr.msra.gmra.mrb[0].mxu0 %v233_v53  ;;  %v2195_v53 = vld [vmem:[%s4946_s2 + $0x318] sm:$0xff] }
  0x29   : > { %3368 = vmatpush3.bf16.msra.mxu0 %v3365_v49  ;;  %2770 = vmatprep.mubr.f32.mxu0 %v4028_v18  ;;  %v2112_v18 = vld [vmem:[%s4946_s2 + $0x120] sm:$0xff] }
  0x2a   : > { %3370 = vmatprep.subr.bf16.mxu0 %v3369_v54  ;;  %v3405_v21 = vpack.c.bf16 %v2113_v20, %v2112_v18  ;;  %3456 = vmatpush3.bf16.msra.mxu1 %v3453_v42  ;;  %v2192_v49 = vld [vmem:[%s4946_s2 + $0x300] sm:$0xff]  ;;  %v2133_v18 = vld [vmem:[%s4946_s2 + $0x238] sm:$0xff]  ;;  %v2164_v42 = vld [vmem:[%s4946_s2 + $0x2b0] sm:$0xff] }
  0x2b   : > { %3458 = vmatprep.subr.bf16.mxu1 %v3457_v45  ;;  %v3525_v52 = vpack.c.bf16 %v2193_v50, %v2192_v49  ;;  %v3505_v44 = vpack.c.bf16 %v2165_v43, %v2164_v42  ;;  %v2169_v49 = vld [vmem:[%s4946_s2 + $0x2d8] sm:$0xff]  ;;  %v2180_v43 = vld [vmem:[%s4946_s2 + $0x3a0] sm:$0xff] }
  0x2d   : > { %3372 = vmatpush3.bf16.msra.mxu0 %v3369_v54  ;;  %v3529_v54 = vpack.c.bf16 %v2195_v53, %v2194_v51  ;;  %v2170_v51 = vld [vmem:[%s4946_s2 + $0x2e0] sm:$0xff] }
  0x2e   : > { %3374 = vmatprep.subr.bf16.mxu0 %v3373_v57  ;;  %3460 = vmatpush3.bf16.msra.mxu1 %v3457_v45  ;;  %v2166_v45 = vld [vmem:[%s4946_s2 + $0x2c0] sm:$0xff] }
  0x2f   : > { %3462 = vmatprep.subr.bf16.mxu1 %v3461_v48  ;;  %v3509_v47 = vpack.c.bf16 %v2167_v46, %v2166_v45  ;;  %v2182_v46 = vld [vmem:[%s4946_s2 + $0x3b0] sm:$0xff] }
  0x31   : > { %3376 = vmatpush3.bf16.msra.mxu0 %v3373_v57  ;;  %v3533_v57 = vpack.c.bf16 %v2197_v56, %v2196_v55  ;;  %v2173_v55 = vld [vmem:[%s4946_s2 + $0x2f8] sm:$0xff] }
  0x32   : > { %3378 = vmatprep.subr.bf16.mxu0 %v3377_v60 }
  0x35   : > { %3380 = vmatpush3.bf16.msra.mxu0 %v3377_v60  ;;  %v3537_v60 = vpack.c.bf16 %v2199_v59, %v2198_v58  ;;  %v2200_v58 = vld [vmem:[%s4946_s2 + $0x340] sm:$0xff]  ;;  %v2201_v59 = vld [vmem:[%s4946_s2 + $0x348] sm:$0xff] }
  0x36   : > { %3382 = vmatprep.subr.bf16.mxu0 %v3381_v63 }
  0x39   : > { %3384 = vmatpush3.bf16.msra.mxu0 %v3381_v63  ;;  %v2125_v63 = vld [vmem:[%s4945_s1 + $0x1] ss:$0 sm:$0xff] }
  0x3a   : > { %3386 = vmatprep.subr.bf16.mxu0 %v3385_v2 }
  0x3d   : > { %3388 = vmatpush3.bf16.msra.mxu0 %v3385_v2 }
  0x3e   : > { %3390 = vmatprep.subr.bf16.mxu0 %v3389_v5 }
  0x41   : > { %3392 = vmatpush3.bf16.msra.mxu0 %v3389_v5 }
  0x42   : > { %3394 = vmatprep.subr.bf16.mxu0 %v3393_v8 }
  0x45   : > { %3396 = vmatpush3.bf16.msra.mxu0 %v3393_v8  ;;  %v2129_v8 = vld [vmem:[%s4946_s2 + $0x218] sm:$0xff] }
  0x46   : > { %3398 = vmatprep.subr.bf16.mxu0 %v3397_v11 }
  0x48   : > { %2771 = vmatmul.mubr.f32.vlgmr.msra.gmra.mrb[0].mxu0 %v4031_v19  ;;  %v2117_v19 = vld [vmem:[%s4946_s2 + $0x148] sm:$0xff] }
  0x49   : > { %3400 = vmatpush3.bf16.msra.mxu0 %v3397_v11  ;;  %2805 = vmatprep.mubr.f32.mxu0 %v400_v17  ;;  %v3413_v26 = vpack.c.bf16 %v2117_v19, %v2116_v25  ;;  %v3465_v11 = vpack.c.bf16 %v2129_v8, %v2128_v7  ;;  %v2132_v17 = vld [vmem:[%s4946_s2 + $0x230] sm:$0xff]  ;;  %v2137_v25 = vld [vmem:[%s4946_s2 + $0x258] sm:$0xff]  ;;  %v2177_v7 = vld [vmem:[%s4946_s2 + $0x388] sm:$0xff] }
  0x4a   : > { %3402 = vmatprep.subr.bf16.mxu0 %v3401_v16  ;;  %v3473_v20 = vpack.c.bf16 %v2133_v18, %v2132_v17  ;;  %v2246_v17 = vld [vmem:[%s4946_s2 + $0x4a0] sm:$0xff]  ;;  %v2247_v18 = vld [vmem:[%s4946_s2 + $0x4a8] sm:$0xff] }
  0x4d   : > { %3404 = vmatpush3.bf16.msra.mxu0 %v3401_v16  ;;  %v3469_v16 = vpack.c.bf16 %v2131_v15, %v2130_v12  ;;  %v2245_v15 = vld [vmem:[%s4946_s2 + $0x498] sm:$0xff] }
  0x4e   : > { %3406 = vmatprep.subr.bf16.mxu0 %v3405_v21 }
  0x51   : > { %3408 = vmatpush3.bf16.msra.mxu0 %v3405_v21  ;;  %v2134_v21 = vld [vmem:[%s4946_s2 + $0x240] sm:$0xff] }
  0x52   : > { %3410 = vmatprep.subr.bf16.mxu0 %v3409_v24  ;;  %v3477_v23 = vpack.c.bf16 %v2135_v22, %v2134_v21  ;;  %v2248_v21 = vld [vmem:[%s4946_s2 + $0x4b0] sm:$0xff]  ;;  %v2249_v22 = vld [vmem:[%s4946_s2 + $0x4b8] sm:$0xff] }
  0x55   : > { %3412 = vmatpush3.bf16.msra.mxu0 %v3409_v24  ;;  %v2136_v24 = vld [vmem:[%s4946_s2 + $0x250] sm:$0xff] }
  0x56   : > { %3414 = vmatprep.subr.bf16.mxu0 %v3413_v26  ;;  %v3481_v19 = vpack.c.bf16 %v2137_v25, %v2136_v24  ;;  %v2250_v24 = vld [vmem:[%s4946_s2 + $0x4c0] sm:$0xff]  ;;  %v2251_v25 = vld [vmem:[%s4946_s2 + $0x4c8] sm:$0xff] }
  0x59   : > { %3416 = vmatpush3.bf16.msra.mxu0 %v3413_v26  ;;  %v2138_v26 = vld [vmem:[%s4946_s2 + $0x260] sm:$0xff] }
  0x5a   : > { %3418 = vmatprep.subr.bf16.mxu0 %v3417_v29  ;;  %v3485_v28 = vpack.c.bf16 %v2139_v27, %v2138_v26  ;;  %v2174_v26 = vld [vmem:[%s4947_s3 + $0x1] ss:$0 sm:$0xff] }
  0x5d   : > { %3420 = vmatpush3.bf16.msra.mxu0 %v3417_v29  ;;  %v2140_v29 = vld [vmem:[%s4946_s2 + $0x270] sm:$0xff] }
  0x5e   : > { %3422 = vmatprep.subr.bf16.mxu0 %v3421_v32  ;;  %v3489_v31 = vpack.c.bf16 %v2141_v30, %v2140_v29 }
  0x61   : > { %3424 = vmatpush3.bf16.msra.mxu0 %v3421_v32  ;;  %v2158_v32 = vld [vmem:[%s4946_s2 + $0x280] sm:$0xff] }
  0x62   : > { %3426 = vmatprep.subr.bf16.mxu0 %v3425_v35  ;;  %v3493_v34 = vpack.c.bf16 %v2159_v33, %v2158_v32  ;;  %v2175_v32 = vld [vmem:[%s4945_s1 + $0x2] ss:$0 sm:$0xff] }
  0x65   : > { %3428 = vmatpush3.bf16.msra.mxu0 %v3425_v35  ;;  %v2160_v35 = vld [vmem:[%s4946_s2 + $0x290] sm:$0xff] }
  0x66   : > { %3526 = vmatprep.subr.bf16.mxu0 %v3525_v52 }
  0x68   : > { %2806 = vmatmul.mubr.f32.vlgmr.msra.gmra.mrb[0].mxu0 %v401_v36  ;;  %v2161_v36 = vld [vmem:[%s4946_s2 + $0x298] sm:$0xff] }
  0x69   : > { %3528 = vmatpush3.bf16.msra.mxu0 %v3525_v52  ;;  %v3497_v37 = vpack.c.bf16 %v2161_v36, %v2160_v35  ;;  %v2171_v52 = vld [vmem:[%s4946_s2 + $0x2e8] sm:$0xff] }
  0x6a   : > { %3530 = vmatprep.subr.bf16.mxu0 %v3529_v54  ;;  %v3517_v53 = vpack.c.bf16 %v2171_v52, %v2170_v51  ;;  %v2186_v52 = vld [vmem:[%s4946_s2 + $0x3d0] sm:$0xff] }
  0x6d   : > { %3532 = vmatpush3.bf16.msra.mxu0 %v3529_v54  ;;  %v2172_v54 = vld [vmem:[%s4946_s2 + $0x2f0] sm:$0xff] }
  0x6e   : > { %3534 = vmatprep.subr.bf16.mxu0 %v3533_v57  ;;  %v3521_v56 = vpack.c.bf16 %v2173_v55, %v2172_v54  ;;  %v2188_v55 = vld [vmem:[%s4946_s2 + $0x3e0] sm:$0xff] }
  0x71   : > { %3536 = vmatpush3.bf16.msra.mxu0 %v3533_v57 }
  0x72   : > { %3538 = vmatprep.subr.bf16.mxu0 %v3537_v60 }
  0x75   : > { %3540 = vmatpush3.bf16.msra.mxu0 %v3537_v60  ;;  %v3541_v60 = vpack.c.bf16 %v2201_v59, %v2200_v58  ;;  %v2190_v58 = vld [vmem:[%s4946_s2 + $0x3f0] sm:$0xff]  ;;  %v2191_v59 = vld [vmem:[%s4946_s2 + $0x3f8] sm:$0xff] }
  0x77   : > { %3542 = vmatprep.subr.bf16.mxu0 %v3541_v60 }
  0x79   : > { %3544 = vmatpush3.bf16.msra.mxu0 %v3541_v60  ;;  %v3585_v60 = vpack.c.bf16 %v2191_v59, %v2190_v58  ;;  %v2228_v59 = vld [vmem:[%s4946_s2 + $0x510] sm:$0xff] }
 0x13b   : > { %v2807_v62 = vpop.f32.mrb[0].mxu0 }
 0x13c   : > { %v502_v0 = vadd.f32 %v2807_v62, %v2124_v61  ;;  %v485_v1 = vpop.f32.mrb[1].mxu0  ;;  %v2203_v62 = vld [vmem:[%s4946_s2 + $0x358] sm:$0xff] }
 0x13d   : > { %v501_v2 = vadd.f32 %v2124_v61, %v485_v1  ;;  %v2202_v61 = vld [vmem:[%s4946_s2 + $0x350] sm:$0xff]  ;;  %v2205_v1 = vld [vmem:[%s4946_s2 + $0x368] sm:$0xff] }
 0x13e   : > { %vm505_vm2 = vcmp.gt.f32.partialorder %v502_v0, 0.0  ;;  %v511_v3 = vmul.f32 %v2125_v63, %v502_v0 }
 0x13f   : > { %vm504_vm3 = vcmp.gt.f32.partialorder %v501_v2, 0.0  ;;  %v510_v4 = vmul.f32 %v2125_v63, %v501_v2  ;;  %v3545_v63 = vpack.c.bf16 %v2203_v62, %v2202_v61  ;;  %v2208_v61 = vld [vmem:[%s4946_s2 + $0x400] sm:$0xff]  ;;  %v2209_v62 = vld [vmem:[%s4946_s2 + $0x408] sm:$0xff] }
 0x140   : > { %v513_v5 = vsel %vm505_vm2, %v502_v0, %v511_v3  ;;  %v2204_v0 = vld [vmem:[%s4946_s2 + $0x360] sm:$0xff]  ;;  %v2206_v3 = vld [vmem:[%s4946_s2 + $0x370] sm:$0xff] }
 0x141   : > { %515 = vst [vmem:[#allocation2 + $0x9] sm:$0xff] %v513_v5  ;;  %v512_v6 = vsel %vm504_vm3, %v501_v2, %v510_v4  ;;  %3546 = vmatprep.subr.bf16.mxu0 %v3545_v63  ;;  %v3549_v2 = vpack.c.bf16 %v2205_v1, %v2204_v0  ;;  %v2207_v4 = vld [vmem:[%s4946_s2 + $0x378] sm:$0xff]  ;;  %v2210_v0 = vld [vmem:[%s4946_s2 + $0x410] sm:$0xff] }
 0x142   : > { %514 = vst [vmem:[#allocation2 + $0x1] sm:$0xff] %v512_v6  ;;  %3548 = vmatpush3.bf16.msra.mxu0 %v3545_v63  ;;  %v3589_v63 = vpack.c.bf16 %v2209_v62, %v2208_v61  ;;  %v2211_v1 = vld [vmem:[%s4946_s2 + $0x418] sm:$0xff] }
 0x143   : > { %3550 = vmatprep.subr.bf16.mxu0 %v3549_v2 }
 0x146   : > { %3552 = vmatpush3.bf16.msra.mxu0 %v3549_v2  ;;  %v3593_v2 = vpack.c.bf16 %v2211_v1, %v2210_v0  ;;  %v2230_v0 = vld [vmem:[%s4946_s2 + $0x520] sm:$0xff]  ;;  %v2231_v1 = vld [vmem:[%s4946_s2 + $0x528] sm:$0xff] }
 0x148   : > { %v703_v57 = vld [vmem:[#allocation2 + $0xa] sm:$0xff] }
 0x149   : > { %v533_v9 = vld [vmem:[#allocation2] sm:$0xff]  ;;  %v534_v10 = vld [vmem:[#allocation2 + $0x8] sm:$0xff] }
 0x14a   : > { %2840 = vmatprep.mubr.f32.mxu1 %v533_v9  ;;  %v702_v40 = vld [vmem:[#allocation2 + $0x2] sm:$0xff] }
 0x14b   : > { %2841 = vmatmul.mubr.f32.vlgmr.msra.gmra.mrb[0].mxu1 %v534_v10  ;;  %v2242_v9 = vld [vmem:[%s4946_s2 + $0x480] sm:$0xff]  ;;  %v2243_v10 = vld [vmem:[%s4946_s2 + $0x488] sm:$0xff] }
 0x14c   : > { %3464 = vmatpush3.bf16.msra.mxu1 %v3461_v48  ;;  %2875 = vmatprep.mubr.f32.mxu1 %v512_v6  ;;  %v2168_v48 = vld [vmem:[%s4946_s2 + $0x2d0] sm:$0xff]  ;;  %v2176_v6 = vld [vmem:[%s4946_s2 + $0x380] sm:$0xff]  ;;  %v3621_v12 = vpack.c.bf16 %v2243_v10, %v2242_v9 }
 0x14d   : > { %3466 = vmatprep.subr.bf16.mxu1 %v3465_v11  ;;  %v3513_v50 = vpack.c.bf16 %v2169_v49, %v2168_v48  ;;  %v3557_v8 = vpack.c.bf16 %v2177_v7, %v2176_v6  ;;  %v2184_v49 = vld [vmem:[%s4946_s2 + $0x3c0] sm:$0xff]  ;;  %v2214_v7 = vld [vmem:[%s4946_s2 + $0x430] sm:$0xff] }
 0x14e   : > { %v2216_v10 = vld [vmem:[%s4946_s2 + $0x440] sm:$0xff] }
 0x150   : > { %3468 = vmatpush3.bf16.msra.mxu1 %v3465_v11  ;;  %v2244_v11 = vld [vmem:[%s4946_s2 + $0x490] sm:$0xff] }
 0x151   : > { %3470 = vmatprep.subr.bf16.mxu1 %v3469_v16 }
 0x154   : > { %3472 = vmatpush3.bf16.msra.mxu1 %v3469_v16  ;;  %v3625_v16 = vpack.c.bf16 %v2245_v15, %v2244_v11  ;;  %v2217_v11 = vld [vmem:[%s4946_s2 + $0x448] sm:$0xff]  ;;  %v2218_v15 = vld [vmem:[%s4946_s2 + $0x450] sm:$0xff] }
 0x155   : > { %3474 = vmatprep.subr.bf16.mxu1 %v3473_v20 }
 0x158   : > { %3476 = vmatpush3.bf16.msra.mxu1 %v3473_v20  ;;  %v3629_v20 = vpack.c.bf16 %v2247_v18, %v2246_v17  ;;  %v2220_v18 = vld [vmem:[%s4946_s2 + $0x460] sm:$0xff] }
 0x159   : > { %3478 = vmatprep.subr.bf16.mxu1 %v3477_v23 }
 0x15c   : > { %3480 = vmatpush3.bf16.msra.mxu1 %v3477_v23  ;;  %v3633_v23 = vpack.c.bf16 %v2249_v22, %v2248_v21  ;;  %v2222_v22 = vld [vmem:[%s4946_s2 + $0x470] sm:$0xff] }
 0x15d   : > { %3482 = vmatprep.subr.bf16.mxu1 %v3481_v19 }
 0x160   : > { %3484 = vmatpush3.bf16.msra.mxu1 %v3481_v19  ;;  %v3637_v19 = vpack.c.bf16 %v2251_v25, %v2250_v24 }
 0x161   : > { %3486 = vmatprep.subr.bf16.mxu1 %v3485_v28 }
 0x164   : > { %3488 = vmatpush3.bf16.msra.mxu1 %v3485_v28 }
 0x165   : > { %3490 = vmatprep.subr.bf16.mxu1 %v3489_v31 }
 0x168   : > { %3492 = vmatpush3.bf16.msra.mxu1 %v3489_v31 }
 0x169   : > { %3494 = vmatprep.subr.bf16.mxu1 %v3493_v34 }
 0x16b   : > { %2876 = vmatmul.mubr.f32.vlgmr.msra.gmra.mrb[0].mxu1 %v513_v5  ;;  %v3553_v5 = vpack.c.bf16 %v2207_v4, %v2206_v3  ;;  %v2212_v3 = vld [vmem:[%s4946_s2 + $0x420] sm:$0xff]  ;;  %v2213_v4 = vld [vmem:[%s4946_s2 + $0x428] sm:$0xff] }
 0x16c   : > { %3496 = vmatpush3.bf16.msra.mxu1 %v3493_v34  ;;  %2910 = vmatprep.mubr.f32.mxu1 %v702_v40  ;;  %v3597_v6 = vpack.c.bf16 %v2213_v4, %v2212_v3  ;;  %v2232_v3 = vld [vmem:[%s4946_s2 + $0x530] sm:$0xff]  ;;  %v2233_v4 = vld [vmem:[%s4946_s2 + $0x538] sm:$0xff] }
 0x16d   : > { %3498 = vmatprep.subr.bf16.mxu1 %v3497_v37  ;;  %3554 = vmatprep.subr.bf16.mxu0 %v3553_v5 }
 0x16e   : > { %3556 = vmatpush3.bf16.msra.mxu0 %v3553_v5 }
 0x16f   : > { %3558 = vmatprep.subr.bf16.mxu0 %v3557_v8 }
 0x170   : > { %3500 = vmatpush3.bf16.msra.mxu1 %v3497_v37 }
 0x171   : > { %3502 = vmatprep.subr.bf16.mxu1 %v3501_v41 }
 0x174   : > { %3504 = vmatpush3.bf16.msra.mxu1 %v3501_v41 }
 0x175   : > { %3506 = vmatprep.subr.bf16.mxu1 %v3505_v44 }
 0x178   : > { %3508 = vmatpush3.bf16.msra.mxu1 %v3505_v44  ;;  %v2181_v44 = vld [vmem:[%s4946_s2 + $0x3a8] sm:$0xff] }
 0x179   : > { %3510 = vmatprep.subr.bf16.mxu1 %v3509_v47  ;;  %v3565_v45 = vpack.c.bf16 %v2181_v44, %v2180_v43  ;;  %v2296_v43 = vld [vmem:[%s4946_s2 + $0x620] sm:$0xff]  ;;  %v2297_v44 = vld [vmem:[%s4946_s2 + $0x628] sm:$0xff] }
 0x17c   : > { %3512 = vmatpush3.bf16.msra.mxu1 %v3509_v47  ;;  %v2183_v47 = vld [vmem:[%s4946_s2 + $0x3b8] sm:$0xff] }
 0x17d   : > { %3514 = vmatprep.subr.bf16.mxu1 %v3513_v50  ;;  %v3569_v48 = vpack.c.bf16 %v2183_v47, %v2182_v46  ;;  %v2298_v46 = vld [vmem:[%s4946_s2 + $0x630] sm:$0xff]  ;;  %v2299_v47 = vld [vmem:[%s4946_s2 + $0x638] sm:$0xff] }
 0x180   : > { %3516 = vmatpush3.bf16.msra.mxu1 %v3513_v50  ;;  %v2185_v50 = vld [vmem:[%s4946_s2 + $0x3c8] sm:$0xff] }
 0x181   : > { %3518 = vmatprep.subr.bf16.mxu1 %v3517_v53  ;;  %v3573_v51 = vpack.c.bf16 %v2185_v50, %v2184_v49  ;;  %v2224_v49 = vld [vmem:[%s4947_s3 + $0x2] ss:$0 sm:$0xff] }
 0x184   : > { %3520 = vmatpush3.bf16.msra.mxu1 %v3517_v53  ;;  %v2187_v53 = vld [vmem:[%s4946_s2 + $0x3d8] sm:$0xff] }
 0x185   : > { %3522 = vmatprep.subr.bf16.mxu1 %v3521_v56  ;;  %v3577_v54 = vpack.c.bf16 %v2187_v53, %v2186_v52 }
 0x188   : > { %3524 = vmatpush3.bf16.msra.mxu1 %v3521_v56  ;;  %v2189_v56 = vld [vmem:[%s4946_s2 + $0x3e8] sm:$0xff] }
 0x189   : > { %3622 = vmatprep.subr.bf16.mxu1 %v3621_v12 }
 0x18b   : > { %2911 = vmatmul.mubr.f32.vlgmr.msra.gmra.mrb[0].mxu1 %v703_v57  ;;  %v3581_v57 = vpack.c.bf16 %v2189_v56, %v2188_v55 }
 0x18c   : > { %3624 = vmatpush3.bf16.msra.mxu1 %v3621_v12  ;;  %v3605_v12 = vpack.c.bf16 %v2217_v11, %v2216_v10  ;;  %v2237_v10 = vld [vmem:[%s4946_s2 + $0x558] sm:$0xff] }
 0x18d   : > { %3626 = vmatprep.subr.bf16.mxu1 %v3625_v16 }
 0x190   : > { %3628 = vmatpush3.bf16.msra.mxu1 %v3625_v16  ;;  %v2219_v16 = vld [vmem:[%s4946_s2 + $0x458] sm:$0xff] }
 0x191   : > { %3630 = vmatprep.subr.bf16.mxu1 %v3629_v20  ;;  %v3609_v17 = vpack.c.bf16 %v2219_v16, %v2218_v15  ;;  %v2239_v15 = vld [vmem:[%s4946_s2 + $0x568] sm:$0xff] }
 0x194   : > { %3632 = vmatpush3.bf16.msra.mxu1 %v3629_v20  ;;  %v2221_v20 = vld [vmem:[%s4946_s2 + $0x468] sm:$0xff] }
 0x195   : > { %3634 = vmatprep.subr.bf16.mxu1 %v3633_v23  ;;  %v3613_v21 = vpack.c.bf16 %v2221_v20, %v2220_v18  ;;  %v2241_v18 = vld [vmem:[%s4946_s2 + $0x578] sm:$0xff] }
 0x198   : > { %3636 = vmatpush3.bf16.msra.mxu1 %v3633_v23  ;;  %v2223_v23 = vld [vmem:[%s4946_s2 + $0x478] sm:$0xff] }
 0x199   : > { %3638 = vmatprep.subr.bf16.mxu1 %v3637_v19  ;;  %v3617_v24 = vpack.c.bf16 %v2223_v23, %v2222_v22  ;;  %v2259_v22 = vld [vmem:[%s4946_s2 + $0x588] sm:$0xff] }
 0x19c   : > { %3640 = vmatpush3.bf16.msra.mxu1 %v3637_v19  ;;  %v2252_v19 = vld [vmem:[%s4946_s2 + $0x4d0] sm:$0xff] }
 0x25e   : > { %v2912_v27 = vpop.f32.mrb[0].mxu1 }
 0x25f   : > { %v804_v28 = vadd.f32 %v2912_v27, %v2174_v26  ;;  %v787_v29 = vpop.f32.mrb[1].mxu1 }
 0x260   : > { %v803_v30 = vadd.f32 %v2174_v26, %v787_v29  ;;  %v2253_v26 = vld [vmem:[%s4946_s2 + $0x4d8] sm:$0xff]  ;;  %v2255_v29 = vld [vmem:[%s4946_s2 + $0x4e8] sm:$0xff] }
 0x261   : > { %v806_v31 = vmul.f32 0.1, %v804_v28  ;;  %v3641_v27 = vpack.c.bf16 %v2253_v26, %v2252_v19  ;;  %v2254_v28 = vld [vmem:[%s4946_s2 + $0x4e0] sm:$0xff] }
 0x262   : > { %v805_v33 = vmul.f32 0.1, %v803_v30  ;;  %v3645_v30 = vpack.c.bf16 %v2255_v29, %v2254_v28  ;;  %v2262_v26 = vld [vmem:[%s4946_s2 + $0x5a0] sm:$0xff] }
 0x263   : > { %v4398_v34 = vadd.f32 %v806_v31, %v4021_v14  ;;  %v2178_v14 = vld [vmem:[%s4946_s2 + $0x390] sm:$0xff]  ;;  %3642 = vmatprep.subr.bf16.mxu1 %v3641_v27 }
 0x264   : > { %v4401_v35 = vadd.f32 %v805_v33, %v4019_v13  ;;  %v2179_v13 = vld [vmem:[%s4946_s2 + $0x398] sm:$0xff]  ;;  %3644 = vmatpush3.bf16.msra.mxu1 %v3641_v27  ;;  %v2256_v31 = vld [vmem:[%s4946_s2 + $0x4f0] sm:$0xff]  ;;  %v2263_v27 = vld [vmem:[%s4946_s2 + $0x5a8] sm:$0xff] }
 0x265   : > { %vm811_vm4 = vcmp.gt.f32.partialorder %v4398_v34, 0.0  ;;  %v817_v36 = vmul.f32 %v2175_v32, %v4398_v34  ;;  %v3561_v42 = vpack.c.bf16 %v2179_v13, %v2178_v14  ;;  %3646 = vmatprep.subr.bf16.mxu1 %v3645_v30  ;;  %v2293_v14 = vld [vmem:[%s4946_s2 + $0x608] sm:$0xff]  ;;  %v2294_v13 = vld [vmem:[%s4946_s2 + $0x610] sm:$0xff]  ;;  %v3693_v29 = vpack.c.bf16 %v2263_v27, %v2262_v26 }
 0x266   : > { %vm810_vm5 = vcmp.gt.f32.partialorder %v4401_v35, 0.0  ;;  %v816_v37 = vmul.f32 %v2175_v32, %v4401_v35  ;;  %v2257_v32 = vld [vmem:[%s4946_s2 + $0x4f8] sm:$0xff] }
 0x267   : > { %v819_v38 = vsel %vm811_vm4, %v4398_v34, %v817_v36  ;;  %v3649_v33 = vpack.c.bf16 %v2257_v32, %v2256_v31  ;;  %v2226_v36 = vld [vmem:[%s4946_s2 + $0x500] sm:$0xff]  ;;  %v2265_v31 = vld [vmem:[%s4946_s2 + $0x5b8] sm:$0xff] }
 0x268   : > { %821 = vst [vmem:[#allocation2 + $0x9] sm:$0xff] %v819_v38  ;;  %v818_v39 = vsel %vm810_vm5, %v4401_v35, %v816_v37  ;;  %3648 = vmatpush3.bf16.msra.mxu1 %v3645_v30  ;;  %v2227_v37 = vld [vmem:[%s4946_s2 + $0x508] sm:$0xff]  ;;  %v2264_v30 = vld [vmem:[%s4946_s2 + $0x5b0] sm:$0xff] }
 0x269   : > { %820 = vst [vmem:[#allocation2 + $0x1] sm:$0xff] %v818_v39  ;;  %3650 = vmatprep.subr.bf16.mxu1 %v3649_v33  ;;  %v3697_v32 = vpack.c.bf16 %v2265_v31, %v2264_v30  ;;  %v2280_v31 = vld [vmem:[%s4946_s2 + $0x6a0] sm:$0xff] }
 0x26c   : > { %3652 = vmatpush3.bf16.msra.mxu1 %v3649_v33  ;;  %v2266_v33 = vld [vmem:[%s4946_s2 + $0x5c0] sm:$0xff] }
 0x26f   : > { %v1009_v25 = vld [vmem:[#allocation2 + $0xa] sm:$0xff] }
 0x270   : > { %v839_v40 = vld [vmem:[#allocation2] sm:$0xff]  ;;  %v840_v41 = vld [vmem:[#allocation2 + $0x8] sm:$0xff] }
 0x271   : > { %2945 = vmatprep.mubr.f32.mxu0 %v839_v40  ;;  %v1008_v5 = vld [vmem:[#allocation2 + $0x2] sm:$0xff] }
 0x272   : > { %2946 = vmatmul.mubr.f32.vlgmr.msra.gmra.mrb[2].mxu0 %v840_v41  ;;  %v2295_v41 = vld [vmem:[%s4946_s2 + $0x618] sm:$0xff] }
 0x273   : > { %3560 = vmatpush3.bf16.msra.mxu0 %v3557_v8  ;;  %2980 = vmatprep.mubr.f32.mxu0 %v818_v39  ;;  %v2215_v8 = vld [vmem:[%s4946_s2 + $0x438] sm:$0xff]  ;;  %v2292_v39 = vld [vmem:[%s4946_s2 + $0x600] sm:$0xff] }
 0x274   : > { %3562 = vmatprep.subr.bf16.mxu0 %v3561_v42  ;;  %v3601_v9 = vpack.c.bf16 %v2215_v8, %v2214_v7  ;;  %v3717_v40 = vpack.c.bf16 %v2293_v14, %v2292_v39  ;;  %v2235_v7 = vld [vmem:[%s4946_s2 + $0x548] sm:$0xff]  ;;  %v2269_v39 = vld [vmem:[%s4946_s2 + $0x5d8] sm:$0xff] }
 0x277   : > { %3564 = vmatpush3.bf16.msra.mxu0 %v3561_v42  ;;  %v3721_v42 = vpack.c.bf16 %v2295_v41, %v2294_v13  ;;  %v2270_v13 = vld [vmem:[%s4946_s2 + $0x5e0] sm:$0xff] }
 0x278   : > { %3566 = vmatprep.subr.bf16.mxu0 %v3565_v45 }
 0x27b   : > { %3568 = vmatpush3.bf16.msra.mxu0 %v3565_v45  ;;  %v3725_v45 = vpack.c.bf16 %v2297_v44, %v2296_v43  ;;  %v2273_v43 = vld [vmem:[%s4946_s2 + $0x5f8] sm:$0xff] }
 0x27c   : > { %3570 = vmatprep.subr.bf16.mxu0 %v3569_v48 }
 0x27f   : > { %3572 = vmatpush3.bf16.msra.mxu0 %v3569_v48  ;;  %v3729_v48 = vpack.c.bf16 %v2299_v47, %v2298_v46  ;;  %v2300_v46 = vld [vmem:[%s4946_s2 + $0x640] sm:$0xff]  ;;  %v2301_v47 = vld [vmem:[%s4946_s2 + $0x648] sm:$0xff] }
 0x280   : > { %3574 = vmatprep.subr.bf16.mxu0 %v3573_v51 }
 0x283   : > { %3576 = vmatpush3.bf16.msra.mxu0 %v3573_v51  ;;  %v2225_v51 = vld [vmem:[%s4945_s1 + $0x3] ss:$0 sm:$0xff] }
 0x284   : > { %3578 = vmatprep.subr.bf16.mxu0 %v3577_v54 }
 0x287   : > { %3580 = vmatpush3.bf16.msra.mxu0 %v3577_v54 }
 0x288   : > { %3582 = vmatprep.subr.bf16.mxu0 %v3581_v57 }
 0x28b   : > { %3584 = vmatpush3.bf16.msra.mxu0 %v3581_v57 }
 0x28c   : > { %3586 = vmatprep.subr.bf16.mxu0 %v3585_v60 }
 0x28f   : > { %3588 = vmatpush3.bf16.msra.mxu0 %v3585_v60  ;;  %v2229_v60 = vld [vmem:[%s4946_s2 + $0x518] sm:$0xff] }
 0x290   : > { %3590 = vmatprep.subr.bf16.mxu0 %v3589_v63 }
 0x292   : > { %2981 = vmatmul.mubr.f32.vlgmr.msra.gmra.mrb[2].mxu0 %v819_v38  ;;  %v3653_v38 = vpack.c.bf16 %v2227_v37, %v2226_v36  ;;  %v2267_v36 = vld [vmem:[%s4946_s2 + $0x5c8] sm:$0xff] }
 0x293   : > { %3592 = vmatpush3.bf16.msra.mxu0 %v3589_v63  ;;  %3015 = vmatprep.mubr.f32.mxu0 %v1008_v5  ;;  %v3657_v63 = vpack.c.bf16 %v2229_v60, %v2228_v59  ;;  %v3665_v5 = vpack.c.bf16 %v2233_v4, %v2232_v3  ;;  %v3701_v37 = vpack.c.bf16 %v2267_v36, %v2266_v33  ;;  %v2277_v59 = vld [vmem:[%s4946_s2 + $0x688] sm:$0xff]  ;;  %v2346_v3 = vld [vmem:[%s4946_s2 + $0x7a0] sm:$0xff]  ;;  %v2282_v36 = vld [vmem:[%s4946_s2 + $0x6b0] sm:$0xff] }
 0x294   : > { %3594 = vmatprep.subr.bf16.mxu0 %v3593_v2  ;;  %3654 = vmatprep.subr.bf16.mxu1 %v3653_v38  ;;  %v2347_v4 = vld [vmem:[%s4946_s2 + $0x7a8] sm:$0xff] }
 0x297   : > { %3596 = vmatpush3.bf16.msra.mxu0 %v3593_v2  ;;  %v3661_v2 = vpack.c.bf16 %v2231_v1, %v2230_v0  ;;  %v2345_v1 = vld [vmem:[%s4946_s2 + $0x798] sm:$0xff] }
 0x298   : > { %3598 = vmatprep.subr.bf16.mxu0 %v3597_v6 }
 0x29b   : > { %3600 = vmatpush3.bf16.msra.mxu0 %v3597_v6  ;;  %v2234_v6 = vld [vmem:[%s4946_s2 + $0x540] sm:$0xff] }
 0x29c   : > { %3602 = vmatprep.subr.bf16.mxu0 %v3601_v9  ;;  %v3669_v8 = vpack.c.bf16 %v2235_v7, %v2234_v6  ;;  %v2348_v6 = vld [vmem:[%s4946_s2 + $0x7b0] sm:$0xff]  ;;  %v2349_v7 = vld [vmem:[%s4946_s2 + $0x7b8] sm:$0xff] }
 0x29f   : > { %3604 = vmatpush3.bf16.msra.mxu0 %v3601_v9  ;;  %v2236_v9 = vld [vmem:[%s4946_s2 + $0x550] sm:$0xff] }
 0x2a0   : > { %3606 = vmatprep.subr.bf16.mxu0 %v3605_v12  ;;  %v3673_v11 = vpack.c.bf16 %v2237_v10, %v2236_v9  ;;  %v2350_v9 = vld [vmem:[%s4946_s2 + $0x7c0] sm:$0xff]  ;;  %v2351_v10 = vld [vmem:[%s4946_s2 + $0x7c8] sm:$0xff] }
 0x2a3   : > { %3608 = vmatpush3.bf16.msra.mxu0 %v3605_v12  ;;  %v2238_v12 = vld [vmem:[%s4946_s2 + $0x560] sm:$0xff] }
 0x2a4   : > { %3610 = vmatprep.subr.bf16.mxu0 %v3609_v17  ;;  %v3677_v16 = vpack.c.bf16 %v2239_v15, %v2238_v12  ;;  %v2274_v12 = vld [vmem:[%s4947_s3 + $0x3] ss:$0 sm:$0xff] }
 0x2a7   : > { %3612 = vmatpush3.bf16.msra.mxu0 %v3609_v17  ;;  %v2240_v17 = vld [vmem:[%s4946_s2 + $0x570] sm:$0xff] }
 0x2a8   : > { %3614 = vmatprep.subr.bf16.mxu0 %v3613_v21  ;;  %v3681_v20 = vpack.c.bf16 %v2241_v18, %v2240_v17 }
 0x2ab   : > { %3616 = vmatpush3.bf16.msra.mxu0 %v3613_v21  ;;  %v2258_v21 = vld [vmem:[%s4946_s2 + $0x580] sm:$0xff] }
 0x2ac   : > { %3618 = vmatprep.subr.bf16.mxu0 %v3617_v24  ;;  %v3685_v23 = vpack.c.bf16 %v2259_v22, %v2258_v21  ;;  %v2275_v21 = vld [vmem:[%s4945_s1 + $0x4] ss:$0 sm:$0xff] }
 0x2af   : > { %3620 = vmatpush3.bf16.msra.mxu0 %v3617_v24  ;;  %v2260_v24 = vld [vmem:[%s4946_s2 + $0x590] sm:$0xff] }
 0x2b0   : > { %3718 = vmatprep.subr.bf16.mxu0 %v3717_v40 }
 0x2b2   : > { %3016 = vmatmul.mubr.f32.vlgmr.msra.gmra.mrb[2].mxu0 %v1009_v25  ;;  %v2261_v25 = vld [vmem:[%s4946_s2 + $0x598] sm:$0xff] }
 0x2b3   : > { %3720 = vmatpush3.bf16.msra.mxu0 %v3717_v40  ;;  %v3689_v19 = vpack.c.bf16 %v2261_v25, %v2260_v24  ;;  %v2271_v40 = vld [vmem:[%s4946_s2 + $0x5e8] sm:$0xff] }
 0x2b4   : > { %3722 = vmatprep.subr.bf16.mxu0 %v3721_v42  ;;  %v3709_v41 = vpack.c.bf16 %v2271_v40, %v2270_v13  ;;  %v2286_v40 = vld [vmem:[%s4946_s2 + $0x6d0] sm:$0xff] }
 0x2b7   : > { %3724 = vmatpush3.bf16.msra.mxu0 %v3721_v42  ;;  %v2272_v42 = vld [vmem:[%s4946_s2 + $0x5f0] sm:$0xff] }
 0x2b8   : > { %3726 = vmatprep.subr.bf16.mxu0 %v3725_v45  ;;  %v3713_v44 = vpack.c.bf16 %v2273_v43, %v2272_v42  ;;  %v2288_v43 = vld [vmem:[%s4946_s2 + $0x6e0] sm:$0xff] }
 0x2bb   : > { %3728 = vmatpush3.bf16.msra.mxu0 %v3725_v45 }
 0x2bc   : > { %3730 = vmatprep.subr.bf16.mxu0 %v3729_v48 }
 0x2bf   : > { %3732 = vmatpush3.bf16.msra.mxu0 %v3729_v48  ;;  %v3733_v48 = vpack.c.bf16 %v2301_v47, %v2300_v46  ;;  %v2290_v46 = vld [vmem:[%s4946_s2 + $0x6f0] sm:$0xff]  ;;  %v2291_v47 = vld [vmem:[%s4946_s2 + $0x6f8] sm:$0xff] }
 0x2c1   : > { %3734 = vmatprep.subr.bf16.mxu0 %v3733_v48 }
 0x2c3   : > { %3736 = vmatpush3.bf16.msra.mxu0 %v3733_v48  ;;  %v3777_v48 = vpack.c.bf16 %v2291_v47, %v2290_v46  ;;  %v2334_v46 = vld [vmem:[%s4946_s2 + $0x840] sm:$0xff]  ;;  %v2335_v47 = vld [vmem:[%s4946_s2 + $0x848] sm:$0xff] }
 0x385   : > { %v3017_v50 = vpop.f32.mrb[2].mxu0 }
 0x386   : > { %v1110_v52 = vadd.f32 %v3017_v50, %v2224_v49  ;;  %v1093_v53 = vpop.f32.mrb[3].mxu0  ;;  %v2303_v50 = vld [vmem:[%s4946_s2 + $0x658] sm:$0xff] }
 0x387   : > { %v1109_v54 = vadd.f32 %v2224_v49, %v1093_v53  ;;  %v2302_v49 = vld [vmem:[%s4946_s2 + $0x650] sm:$0xff]  ;;  %v2305_v53 = vld [vmem:[%s4946_s2 + $0x668] sm:$0xff] }
 0x388   : > { %vm1113_vm6 = vcmp.gt.f32.partialorder %v1110_v52, 0.0  ;;  %v1119_v55 = vmul.f32 %v2225_v51, %v1110_v52 }
 0x389   : > { %vm1112_vm7 = vcmp.gt.f32.partialorder %v1109_v54, 0.0  ;;  %v1118_v56 = vmul.f32 %v2225_v51, %v1109_v54  ;;  %v3737_v51 = vpack.c.bf16 %v2303_v50, %v2302_v49  ;;  %v2308_v49 = vld [vmem:[%s4946_s2 + $0x700] sm:$0xff]  ;;  %v2309_v50 = vld [vmem:[%s4946_s2 + $0x708] sm:$0xff] }
 0x38a   : > { %v1121_v57 = vsel %vm1113_vm6, %v1110_v52, %v1119_v55  ;;  %v2304_v52 = vld [vmem:[%s4946_s2 + $0x660] sm:$0xff]  ;;  %v2306_v55 = vld [vmem:[%s4946_s2 + $0x670] sm:$0xff] }
 0x38b   : > { %1123 = vst [vmem:[#allocation2 + $0x9] sm:$0xff] %v1121_v57  ;;  %v1120_v58 = vsel %vm1112_vm7, %v1109_v54, %v1118_v56  ;;  %3738 = vmatprep.subr.bf16.mxu0 %v3737_v51  ;;  %v3741_v54 = vpack.c.bf16 %v2305_v53, %v2304_v52  ;;  %v2307_v56 = vld [vmem:[%s4946_s2 + $0x678] sm:$0xff]  ;;  %v2310_v52 = vld [vmem:[%s4946_s2 + $0x710] sm:$0xff] }
 0x38c   : > { %1122 = vst [vmem:[#allocation2 + $0x1] sm:$0xff] %v1120_v58  ;;  %3740 = vmatpush3.bf16.msra.mxu0 %v3737_v51  ;;  %v3781_v51 = vpack.c.bf16 %v2309_v50, %v2308_v49  ;;  %v2311_v53 = vld [vmem:[%s4946_s2 + $0x718] sm:$0xff]  ;;  %v2336_v49 = vld [vmem:[%s4946_s2 + $0x850] sm:$0xff] }
 0x38d   : > { %3742 = vmatprep.subr.bf16.mxu0 %v3741_v54  ;;  %v2337_v50 = vld [vmem:[%s4946_s2 + $0x858] sm:$0xff] }
 0x390   : > { %3744 = vmatpush3.bf16.msra.mxu0 %v3741_v54  ;;  %v3785_v54 = vpack.c.bf16 %v2311_v53, %v2310_v52  ;;  %v2338_v52 = vld [vmem:[%s4946_s2 + $0x860] sm:$0xff]  ;;  %v2339_v53 = vld [vmem:[%s4946_s2 + $0x868] sm:$0xff] }
 0x392   : > { %v1311_v45 = vld [vmem:[#allocation2 + $0xa] sm:$0xff] }
 0x393   : > { %v1141_v61 = vld [vmem:[#allocation2] sm:$0xff]  ;;  %v1142_v62 = vld [vmem:[#allocation2 + $0x8] sm:$0xff] }
 0x394   : > { %3050 = vmatprep.mubr.f32.mxu1 %v1141_v61  ;;  %v1310_v28 = vld [vmem:[#allocation2 + $0x2] sm:$0xff] }
 0x395   : > { %3051 = vmatmul.mubr.f32.vlgmr.msra.gmra.mrb[2].mxu1 %v1142_v62  ;;  %v2342_v61 = vld [vmem:[%s4946_s2 + $0x780] sm:$0xff]  ;;  %v2343_v62 = vld [vmem:[%s4946_s2 + $0x788] sm:$0xff] }
 0x396   : > { %3656 = vmatpush3.bf16.msra.mxu1 %v3653_v38  ;;  %3085 = vmatprep.mubr.f32.mxu1 %v1120_v58  ;;  %v2268_v38 = vld [vmem:[%s4946_s2 + $0x5d0] sm:$0xff]  ;;  %v2276_v58 = vld [vmem:[%s4946_s2 + $0x680] sm:$0xff]  ;;  %v3813_v0 = vpack.c.bf16 %v2343_v62, %v2342_v61 }
 0x397   : > { %3658 = vmatprep.subr.bf16.mxu1 %v3657_v63  ;;  %v3705_v14 = vpack.c.bf16 %v2269_v39, %v2268_v38  ;;  %v3749_v60 = vpack.c.bf16 %v2277_v59, %v2276_v58  ;;  %v2284_v39 = vld [vmem:[%s4946_s2 + $0x6c0] sm:$0xff]  ;;  %v2314_v59 = vld [vmem:[%s4946_s2 + $0x730] sm:$0xff] }
 0x398   : > { %v2316_v62 = vld [vmem:[%s4946_s2 + $0x740] sm:$0xff] }
 0x39a   : > { %3660 = vmatpush3.bf16.msra.mxu1 %v3657_v63  ;;  %v2344_v63 = vld [vmem:[%s4946_s2 + $0x790] sm:$0xff] }
 0x39b   : > { %3662 = vmatprep.subr.bf16.mxu1 %v3661_v2 }
 0x39e   : > { %3664 = vmatpush3.bf16.msra.mxu1 %v3661_v2  ;;  %v3817_v2 = vpack.c.bf16 %v2345_v1, %v2344_v63  ;;  %v2317_v63 = vld [vmem:[%s4946_s2 + $0x748] sm:$0xff]  ;;  %v2318_v1 = vld [vmem:[%s4946_s2 + $0x750] sm:$0xff] }
 0x39f   : > { %3666 = vmatprep.subr.bf16.mxu1 %v3665_v5 }
 0x3a2   : > { %3668 = vmatpush3.bf16.msra.mxu1 %v3665_v5  ;;  %v3821_v5 = vpack.c.bf16 %v2347_v4, %v2346_v3  ;;  %v2320_v4 = vld [vmem:[%s4946_s2 + $0x760] sm:$0xff] }
 0x3a3   : > { %3670 = vmatprep.subr.bf16.mxu1 %v3669_v8 }
 0x3a6   : > { %3672 = vmatpush3.bf16.msra.mxu1 %v3669_v8  ;;  %v3825_v8 = vpack.c.bf16 %v2349_v7, %v2348_v6  ;;  %v2322_v7 = vld [vmem:[%s4946_s2 + $0x770] sm:$0xff] }
 0x3a7   : > { %3674 = vmatprep.subr.bf16.mxu1 %v3673_v11 }
 0x3aa   : > { %3676 = vmatpush3.bf16.msra.mxu1 %v3673_v11  ;;  %v3829_v11 = vpack.c.bf16 %v2351_v10, %v2350_v9 }
 0x3ab   : > { %3678 = vmatprep.subr.bf16.mxu1 %v3677_v16 }
 0x3ae   : > { %3680 = vmatpush3.bf16.msra.mxu1 %v3677_v16 }
 0x3af   : > { %3682 = vmatprep.subr.bf16.mxu1 %v3681_v20 }
 0x3b2   : > { %3684 = vmatpush3.bf16.msra.mxu1 %v3681_v20 }
 0x3b3   : > { %3686 = vmatprep.subr.bf16.mxu1 %v3685_v23 }
 0x3b5   : > { %3086 = vmatmul.mubr.f32.vlgmr.msra.gmra.mrb[2].mxu1 %v1121_v57  ;;  %v3745_v57 = vpack.c.bf16 %v2307_v56, %v2306_v55  ;;  %v2312_v55 = vld [vmem:[%s4946_s2 + $0x720] sm:$0xff]  ;;  %v2313_v56 = vld [vmem:[%s4946_s2 + $0x728] sm:$0xff] }
 0x3b6   : > { %3688 = vmatpush3.bf16.msra.mxu1 %v3685_v23  ;;  %3120 = vmatprep.mubr.f32.mxu1 %v1310_v28  ;;  %v3789_v58 = vpack.c.bf16 %v2313_v56, %v2312_v55  ;;  %v2340_v55 = vld [vmem:[%s4946_s2 + $0x870] sm:$0xff]  ;;  %v2341_v56 = vld [vmem:[%s4946_s2 + $0x878] sm:$0xff] }
 0x3b7   : > { %3690 = vmatprep.subr.bf16.mxu1 %v3689_v19  ;;  %3746 = vmatprep.subr.bf16.mxu0 %v3745_v57 }
 0x3b8   : > { %3748 = vmatpush3.bf16.msra.mxu0 %v3745_v57 }
 0x3b9   : > { %3750 = vmatprep.subr.bf16.mxu0 %v3749_v60 }
 0x3ba   : > { %3692 = vmatpush3.bf16.msra.mxu1 %v3689_v19 }
 0x3bb   : > { %3694 = vmatprep.subr.bf16.mxu1 %v3693_v29 }
 0x3be   : > { %3696 = vmatpush3.bf16.msra.mxu1 %v3693_v29 }
 0x3bf   : > { %3698 = vmatprep.subr.bf16.mxu1 %v3697_v32 }
 0x3c2   : > { %3700 = vmatpush3.bf16.msra.mxu1 %v3697_v32  ;;  %v2281_v32 = vld [vmem:[%s4946_s2 + $0x6a8] sm:$0xff] }
 0x3c3   : > { %3702 = vmatprep.subr.bf16.mxu1 %v3701_v37  ;;  %v3757_v33 = vpack.c.bf16 %v2281_v32, %v2280_v31 }
 0x3c6   : > { %3704 = vmatpush3.bf16.msra.mxu1 %v3701_v37  ;;  %v2283_v37 = vld [vmem:[%s4946_s2 + $0x6b8] sm:$0xff] }
 0x3c7   : > { %3706 = vmatprep.subr.bf16.mxu1 %v3705_v14  ;;  %v3761_v38 = vpack.c.bf16 %v2283_v37, %v2282_v36  ;;  %v2328_v37 = vld [vmem:[%s4946_s2 + $0x810] sm:$0xff] }
 0x3ca   : > { %3708 = vmatpush3.bf16.msra.mxu1 %v3705_v14  ;;  %v2285_v14 = vld [vmem:[%s4946_s2 + $0x6c8] sm:$0xff] }
 0x3cb   : > { %3710 = vmatprep.subr.bf16.mxu1 %v3709_v41  ;;  %v3765_v13 = vpack.c.bf16 %v2285_v14, %v2284_v39 }
 0x3ce   : > { %3712 = vmatpush3.bf16.msra.mxu1 %v3709_v41  ;;  %v2287_v41 = vld [vmem:[%s4946_s2 + $0x6d8] sm:$0xff] }
 0x3cf   : > { %3714 = vmatprep.subr.bf16.mxu1 %v3713_v44  ;;  %v3769_v42 = vpack.c.bf16 %v2287_v41, %v2286_v40  ;;  %v2330_v40 = vld [vmem:[%s4946_s2 + $0x820] sm:$0xff]  ;;  %v2331_v41 = vld [vmem:[%s4946_s2 + $0x828] sm:$0xff] }
 0x3d2   : > { %3716 = vmatpush3.bf16.msra.mxu1 %v3713_v44  ;;  %v2289_v44 = vld [vmem:[%s4946_s2 + $0x6e8] sm:$0xff] }
 0x3d3   : > { %3814 = vmatprep.subr.bf16.mxu1 %v3813_v0 }
 0x3d5   : > { %3121 = vmatmul.mubr.f32.vlgmr.msra.gmra.mrb[2].mxu1 %v1311_v45  ;;  %v3773_v45 = vpack.c.bf16 %v2289_v44, %v2288_v43  ;;  %v2332_v43 = vld [vmem:[%s4946_s2 + $0x830] sm:$0xff]  ;;  %v2333_v44 = vld [vmem:[%s4946_s2 + $0x838] sm:$0xff] }
 0x3d6   : > { %3816 = vmatpush3.bf16.msra.mxu1 %v3813_v0  ;;  %v3797_v0 = vpack.c.bf16 %v2317_v63, %v2316_v62  ;;  %v2361_v62 = vld [vmem:[%s4946_s2 + $0x898] sm:$0xff] }
 0x3d7   : > { %3818 = vmatprep.subr.bf16.mxu1 %v3817_v2 }
 0x3da   : > { %3820 = vmatpush3.bf16.msra.mxu1 %v3817_v2  ;;  %v2319_v2 = vld [vmem:[%s4946_s2 + $0x758] sm:$0xff] }
 0x3db   : > { %3822 = vmatprep.subr.bf16.mxu1 %v3821_v5  ;;  %v3801_v3 = vpack.c.bf16 %v2319_v2, %v2318_v1  ;;  %v2363_v1 = vld [vmem:[%s4946_s2 + $0x8a8] sm:$0xff] }
 0x3de   : > { %3824 = vmatpush3.bf16.msra.mxu1 %v3821_v5  ;;  %v2321_v5 = vld [vmem:[%s4946_s2 + $0x768] sm:$0xff] }
 0x3df   : > { %3826 = vmatprep.subr.bf16.mxu1 %v3825_v8  ;;  %v3805_v6 = vpack.c.bf16 %v2321_v5, %v2320_v4  ;;  %v2364_v4 = vld [vmem:[%s4946_s2 + $0x8b0] sm:$0xff]  ;;  %v2365_v5 = vld [vmem:[%s4946_s2 + $0x8b8] sm:$0xff] }
 0x3e2   : > { %3828 = vmatpush3.bf16.msra.mxu1 %v3825_v8  ;;  %v2323_v8 = vld [vmem:[%s4946_s2 + $0x778] sm:$0xff] }
 0x3e3   : > { %3830 = vmatprep.subr.bf16.mxu1 %v3829_v11  ;;  %v3809_v9 = vpack.c.bf16 %v2323_v8, %v2322_v7  ;;  %v2366_v7 = vld [vmem:[%s4946_s2 + $0x8c0] sm:$0xff]  ;;  %v2367_v8 = vld [vmem:[%s4946_s2 + $0x8c8] sm:$0xff] }
 0x3e6   : > { %3832 = vmatpush3.bf16.msra.mxu1 %v3829_v11  ;;  %v2352_v11 = vld [vmem:[%s4946_s2 + $0x7d0] sm:$0xff] }
 0x4a8   : > { %v3122_v15 = vpop.f32.mrb[2].mxu1 }
 0x4a9   : > { %v1412_v16 = vadd.f32 %v3122_v15, %v2274_v12  ;;  %v1395_v17 = vpop.f32.mrb[3].mxu1 }
 0x4aa   : > { %v1411_v18 = vadd.f32 %v2274_v12, %v1395_v17  ;;  %v2353_v12 = vld [vmem:[%s4946_s2 + $0x7d8] sm:$0xff]  ;;  %v2355_v17 = vld [vmem:[%s4946_s2 + $0x7e8] sm:$0xff] }
 0x4ab   : > { %v1414_v20 = vmul.f32 0.1, %v1412_v16  ;;  %v3833_v15 = vpack.c.bf16 %v2353_v12, %v2352_v11  ;;  %v2354_v16 = vld [vmem:[%s4946_s2 + $0x7e0] sm:$0xff]  ;;  %v2369_v11 = vld [vmem:[%s4946_s2 + $0x8d8] sm:$0xff] }
 0x4ac   : > { %v1413_v22 = vmul.f32 0.1, %v1411_v18  ;;  %v3837_v18 = vpack.c.bf16 %v2355_v17, %v2354_v16  ;;  %v2371_v16 = vld [vmem:[%s4946_s2 + $0x8e8] sm:$0xff] }
 0x4ad   : > { %v4710_v23 = vadd.f32 %v1414_v20, %v4398_v34  ;;  %v2278_v34 = vld [vmem:[%s4946_s2 + $0x690] sm:$0xff]  ;;  %3834 = vmatprep.subr.bf16.mxu1 %v3833_v15 }
 0x4ae   : > { %v4713_v24 = vadd.f32 %v1413_v22, %v4401_v35  ;;  %v2279_v35 = vld [vmem:[%s4946_s2 + $0x698] sm:$0xff]  ;;  %3836 = vmatpush3.bf16.msra.mxu1 %v3833_v15  ;;  %v2356_v20 = vld [vmem:[%s4946_s2 + $0x7f0] sm:$0xff]  ;;  %v2370_v15 = vld [vmem:[%s4946_s2 + $0x8e0] sm:$0xff] }
 0x4af   : > { %vm1419_vm8 = vcmp.gt.f32.partialorder %v4710_v23, 0.0  ;;  %v1425_v25 = vmul.f32 %v2275_v21, %v4710_v23  ;;  %v3753_v30 = vpack.c.bf16 %v2279_v35, %v2278_v34  ;;  %3838 = vmatprep.subr.bf16.mxu1 %v3837_v18  ;;  %v2325_v35 = vld [vmem:[%s4945_s1 + $0x5] ss:$0 sm:$0xff]  ;;  %v3901_v17 = vpack.c.bf16 %v2371_v16, %v2370_v15 }
 0x4b0   : > { %vm1418_vm9 = vcmp.gt.f32.partialorder %v4713_v24, 0.0  ;;  %v1424_v19 = vmul.f32 %v2275_v21, %v4713_v24  ;;  %v2357_v21 = vld [vmem:[%s4946_s2 + $0x7f8] sm:$0xff] }
 0x4b1   : > { %v1427_v26 = vsel %vm1419_vm8, %v4710_v23, %v1425_v25  ;;  %v3841_v22 = vpack.c.bf16 %v2357_v21, %v2356_v20  ;;  %v2326_v25 = vld [vmem:[%s4946_s2 + $0x800] sm:$0xff]  ;;  %v2373_v20 = vld [vmem:[%s4946_s2 + $0x8f8] sm:$0xff] }
 0x4b2   : > { %1429 = vst [vmem:[#allocation2 + $0x9] sm:$0xff] %v1427_v26  ;;  %v1426_v27 = vsel %vm1418_vm9, %v4713_v24, %v1424_v19  ;;  %3840 = vmatpush3.bf16.msra.mxu1 %v3837_v18  ;;  %v2327_v19 = vld [vmem:[%s4946_s2 + $0x808] sm:$0xff]  ;;  %v2372_v18 = vld [vmem:[%s4946_s2 + $0x8f0] sm:$0xff] }
 0x4b3   : > { %1428 = vst [vmem:[#allocation2 + $0x1] sm:$0xff] %v1426_v27  ;;  %3842 = vmatprep.subr.bf16.mxu1 %v3841_v22  ;;  %v3905_v21 = vpack.c.bf16 %v2373_v20, %v2372_v18 }
 0x4b6   : > { %3844 = vmatpush3.bf16.msra.mxu1 %v3841_v22 }
 0x4b9   : > { %v1617_v10 = vld [vmem:[#allocation2 + $0xa] sm:$0xff] }
 0x4ba   : > { %v1447_v28 = vld [vmem:[#allocation2] sm:$0xff]  ;;  %v1448_v29 = vld [vmem:[#allocation2 + $0x8] sm:$0xff] }
 0x4bb   : > { %3155 = vmatprep.mubr.f32.mxu0 %v1447_v28  ;;  %v1616_v57 = vld [vmem:[#allocation2 + $0x2] sm:$0xff] }
 0x4bc   : > { %3156 = vmatmul.mubr.f32.vlgmr.msra.gmra.mrb[4].mxu0 %v1448_v29 }
 0x4bd   : > { %3752 = vmatpush3.bf16.msra.mxu0 %v3749_v60  ;;  %3190 = vmatprep.mubr.f32.mxu0 %v1426_v27  ;;  %v2315_v60 = vld [vmem:[%s4946_s2 + $0x738] sm:$0xff]  ;;  %v2324_v27 = vld [vmem:[%s4947_s3 + $0x4] ss:$0 sm:$0xff] }
 0x4be   : > { %3754 = vmatprep.subr.bf16.mxu0 %v3753_v30  ;;  %v3793_v61 = vpack.c.bf16 %v2315_v60, %v2314_v59  ;;  %v2359_v59 = vld [vmem:[%s4946_s2 + $0x888] sm:$0xff] }
 0x4c1   : > { %3756 = vmatpush3.bf16.msra.mxu0 %v3753_v30 }
 0x4c2   : > { %3758 = vmatprep.subr.bf16.mxu0 %v3757_v33 }
 0x4c5   : > { %3760 = vmatpush3.bf16.msra.mxu0 %v3757_v33 }
 0x4c6   : > { %3762 = vmatprep.subr.bf16.mxu0 %v3761_v38 }
 0x4c9   : > { %3764 = vmatpush3.bf16.msra.mxu0 %v3761_v38  ;;  %v2329_v38 = vld [vmem:[%s4946_s2 + $0x818] sm:$0xff] }
 0x4ca   : > { %3766 = vmatprep.subr.bf16.mxu0 %v3765_v13 }
 0x4cd   : > { %3768 = vmatpush3.bf16.msra.mxu0 %v3765_v13  ;;  %v3849_v13 = vpack.c.bf16 %v2329_v38, %v2328_v37 }
 0x4ce   : > { %3770 = vmatprep.subr.bf16.mxu0 %v3769_v42 }
 0x4d1   : > { %3772 = vmatpush3.bf16.msra.mxu0 %v3769_v42  ;;  %v3853_v42 = vpack.c.bf16 %v2331_v41, %v2330_v40 }
 0x4d2   : > { %3774 = vmatprep.subr.bf16.mxu0 %v3773_v45 }
 0x4d5   : > { %3776 = vmatpush3.bf16.msra.mxu0 %v3773_v45  ;;  %v3857_v45 = vpack.c.bf16 %v2333_v44, %v2332_v43 }
 0x4d6   : > { %3778 = vmatprep.subr.bf16.mxu0 %v3777_v48 }
 0x4d9   : > { %3780 = vmatpush3.bf16.msra.mxu0 %v3777_v48  ;;  %v3861_v48 = vpack.c.bf16 %v2335_v47, %v2334_v46 }
 0x4da   : > { %3782 = vmatprep.subr.bf16.mxu0 %v3781_v51 }
 0x4dc   : > { %3191 = vmatmul.mubr.f32.vlgmr.msra.gmra.mrb[4].mxu0 %v1427_v26  ;;  %v3845_v26 = vpack.c.bf16 %v2327_v19, %v2326_v25  ;;  %v2374_v25 = vld [vmem:[%s4947_s3 + $0x5] ss:$0 sm:$0xff] }
 0x4dd   : > { %3784 = vmatpush3.bf16.msra.mxu0 %v3781_v51  ;;  %3225 = vmatprep.mubr.f32.mxu0 %v1616_v57  ;;  %v3865_v51 = vpack.c.bf16 %v2337_v50, %v2336_v49  ;;  %v3873_v57 = vpack.c.bf16 %v2341_v56, %v2340_v55 }
 0x4de   : > { %3786 = vmatprep.subr.bf16.mxu0 %v3785_v54  ;;  %3846 = vmatprep.subr.bf16.mxu1 %v3845_v26 }
 0x4e1   : > { %3788 = vmatpush3.bf16.msra.mxu0 %v3785_v54  ;;  %v3869_v54 = vpack.c.bf16 %v2339_v53, %v2338_v52 }
 0x4e2   : > { %3790 = vmatprep.subr.bf16.mxu0 %v3789_v58 }
 0x4e5   : > { %3792 = vmatpush3.bf16.msra.mxu0 %v3789_v58  ;;  %v2358_v58 = vld [vmem:[%s4946_s2 + $0x880] sm:$0xff] }
 0x4e6   : > { %3794 = vmatprep.subr.bf16.mxu0 %v3793_v61  ;;  %v3877_v60 = vpack.c.bf16 %v2359_v59, %v2358_v58 }
 0x4e9   : > { %3796 = vmatpush3.bf16.msra.mxu0 %v3793_v61  ;;  %v2360_v61 = vld [vmem:[%s4946_s2 + $0x890] sm:$0xff] }
 0x4ea   : > { %3798 = vmatprep.subr.bf16.mxu0 %v3797_v0  ;;  %v3881_v63 = vpack.c.bf16 %v2361_v62, %v2360_v61 }
 0x4ed   : > { %3800 = vmatpush3.bf16.msra.mxu0 %v3797_v0  ;;  %v2362_v0 = vld [vmem:[%s4946_s2 + $0x8a0] sm:$0xff] }
 0x4ee   : > { %3802 = vmatprep.subr.bf16.mxu0 %v3801_v3 }
 0x4f1   : > { %3804 = vmatpush3.bf16.msra.mxu0 %v3801_v3  ;;  %v3885_v3 = vpack.c.bf16 %v2363_v1, %v2362_v0 }
 0x4f2   : > { %3806 = vmatprep.subr.bf16.mxu0 %v3805_v6 }
 0x4f5   : > { %3808 = vmatpush3.bf16.msra.mxu0 %v3805_v6  ;;  %v3889_v6 = vpack.c.bf16 %v2365_v5, %v2364_v4 }
 0x4f6   : > { %3810 = vmatprep.subr.bf16.mxu0 %v3809_v9 }
 0x4f9   : > { %3812 = vmatpush3.bf16.msra.mxu0 %v3809_v9  ;;  %v3893_v9 = vpack.c.bf16 %v2367_v8, %v2366_v7 }
 0x4fc   : > { %3226 = vmatmul.mubr.f32.vlgmr.msra.gmra.mrb[4].mxu0 %v1617_v10  ;;  %v2368_v10 = vld [vmem:[%s4946_s2 + $0x8d0] sm:$0xff] }
 0x4fd   : > { %v3897_v12 = vpack.c.bf16 %v2369_v11, %v2368_v10 }
 0x5cf   : > { %v3227_v34 = vpop.f32.mrb[4].mxu0 }
 0x5d0   : > { %v1718_v28 = vadd.f32 %v3227_v34, %v2324_v27  ;;  %v1701_v29 = vpop.f32.mrb[5].mxu0 }
 0x5d1   : > { %v1717_v30 = vadd.f32 %v2324_v27, %v1701_v29 }
 0x5d2   : > { %vm1721_vm10 = vcmp.gt.f32.partialorder %v1718_v28, 0.0  ;;  %v1727_v31 = vmul.f32 %v2325_v35, %v1718_v28 }
 0x5d3   : > { %vm1720_vm11 = vcmp.gt.f32.partialorder %v1717_v30, 0.0  ;;  %v1726_v32 = vmul.f32 %v2325_v35, %v1717_v30 }
 0x5d4   : > { %v1729_v33 = vsel %vm1721_vm10, %v1718_v28, %v1727_v31 }
 0x5d5   : > { %1731 = vst [vmem:[#allocation2 + $0x9] sm:$0xff] %v1729_v33  ;;  %v1728_v36 = vsel %vm1720_vm11, %v1717_v30, %v1726_v32 }
 0x5d6   : > { %1730 = vst [vmem:[#allocation2 + $0x1] sm:$0xff] %v1728_v36 }
 0x5dc   : > { %v1919_v22 = vld [vmem:[#allocation2 + $0xa] sm:$0xff] }
 0x5dd   : > { %v1749_v39 = vld [vmem:[#allocation2] sm:$0xff]  ;;  %v1750_v14 = vld [vmem:[#allocation2 + $0x8] sm:$0xff] }
 0x5de   : > { %3260 = vmatprep.mubr.f32.mxu1 %v1749_v39  ;;  %v1918_v2 = vld [vmem:[#allocation2 + $0x2] sm:$0xff] }
 0x5df   : > { %3261 = vmatmul.mubr.f32.vlgmr.msra.gmra.mrb[4].mxu1 %v1750_v14 }
 0x5e0   : > { %3848 = vmatpush3.bf16.msra.mxu1 %v3845_v26  ;;  %3295 = vmatprep.mubr.f32.mxu1 %v1728_v36 }
 0x5e1   : > { %3850 = vmatprep.subr.bf16.mxu1 %v3849_v13 }
 0x5e4   : > { %3852 = vmatpush3.bf16.msra.mxu1 %v3849_v13 }
 0x5e5   : > { %3854 = vmatprep.subr.bf16.mxu1 %v3853_v42 }
 0x5e8   : > { %3856 = vmatpush3.bf16.msra.mxu1 %v3853_v42 }
 0x5e9   : > { %3858 = vmatprep.subr.bf16.mxu1 %v3857_v45 }
 0x5ec   : > { %3860 = vmatpush3.bf16.msra.mxu1 %v3857_v45 }
 0x5ed   : > { %3862 = vmatprep.subr.bf16.mxu1 %v3861_v48 }
 0x5f0   : > { %3864 = vmatpush3.bf16.msra.mxu1 %v3861_v48 }
 0x5f1   : > { %3866 = vmatprep.subr.bf16.mxu1 %v3865_v51 }
 0x5f4   : > { %3868 = vmatpush3.bf16.msra.mxu1 %v3865_v51 }
 0x5f5   : > { %3870 = vmatprep.subr.bf16.mxu1 %v3869_v54 }
 0x5f8   : > { %3872 = vmatpush3.bf16.msra.mxu1 %v3869_v54 }
 0x5f9   : > { %3874 = vmatprep.subr.bf16.mxu1 %v3873_v57 }
 0x5fc   : > { %3876 = vmatpush3.bf16.msra.mxu1 %v3873_v57 }
 0x5fd   : > { %3878 = vmatprep.subr.bf16.mxu1 %v3877_v60 }
 0x5ff   : > { %3296 = vmatmul.mubr.f32.vlgmr.msra.gmra.mrb[4].mxu1 %v1729_v33 }
 0x600   : > { %3880 = vmatpush3.bf16.msra.mxu1 %v3877_v60  ;;  %3330 = vmatprep.mubr.f32.mxu1 %v1918_v2 }
 0x601   : > { %3882 = vmatprep.subr.bf16.mxu1 %v3881_v63 }
 0x604   : > { %3884 = vmatpush3.bf16.msra.mxu1 %v3881_v63 }
 0x605   : > { %3886 = vmatprep.subr.bf16.mxu1 %v3885_v3 }
 0x608   : > { %3888 = vmatpush3.bf16.msra.mxu1 %v3885_v3 }
 0x609   : > { %3890 = vmatprep.subr.bf16.mxu1 %v3889_v6 }
 0x60c   : > { %3892 = vmatpush3.bf16.msra.mxu1 %v3889_v6 }
 0x60d   : > { %3894 = vmatprep.subr.bf16.mxu1 %v3893_v9 }
 0x610   : > { %3896 = vmatpush3.bf16.msra.mxu1 %v3893_v9 }
 0x611   : > { %3898 = vmatprep.subr.bf16.mxu1 %v3897_v12 }
 0x614   : > { %3900 = vmatpush3.bf16.msra.mxu1 %v3897_v12 }
 0x615   : > { %3902 = vmatprep.subr.bf16.mxu1 %v3901_v17 }
 0x618   : > { %3904 = vmatpush3.bf16.msra.mxu1 %v3901_v17 }
 0x619   : > { %3906 = vmatprep.subr.bf16.mxu1 %v3905_v21 }
 0x61c   : > { %3908 = vmatpush3.bf16.msra.mxu1 %v3905_v21 }
 0x61f   : > { %3331 = vmatmul.mubr.f32.vlgmr.msra.gmra.mrb[4].mxu1 %v1919_v22 }
 0x6f2   : > { %v3332_v19 = vpop.f32.mrb[4].mxu1 }
 0x6f3   : > { %v2020_v26 = vadd.f32 %v3332_v19, %v2374_v25  ;;  %v2003_v27 = vpop.f32.mrb[5].mxu1 }
 0x6f4   : > { %v2019_v34 = vadd.f32 %v2374_v25, %v2003_v27 }
 0x6f5   : > { %v2022_v35 = vmul.f32 0.1, %v2020_v26 }
 0x6f6   : > { %v2021_v28 = vmul.f32 0.1, %v2019_v34 }
 0x6f7   : > { %v2024_v29 = vadd.f32 %v2022_v35, %v4710_v23 }
 0x6f8   : > { %v2023_v30 = vadd.f32 %v2021_v28, %v4713_v24 }
 0x6f9   : > { %2026 = vst [vmem:[%s197_s24 + $0x8] sm:$0xff] %v2024_v29 }
 0x6fa   : > { %2025 = vst [vmem:[%s197_s24] sm:$0xff] %v2023_v30 }
 0x6fb PF: > { %s14_s15 = sadd.s32 1, %s3948_s15  }
 0x6fc   : > { %p11_p4 = scmp.ge.s32.totalorder %s14_s15, 4  }
 0x6fe   :  { %13 = sbr.rel (!%p11_p4) target bundleno = 1 (0x1), region = 83 }

</bundles_post_ra>
